<compile_context>
chip_gen: v6e
topology: v6e:2x2x1
jax: 0.10.0
libtpu: 0.0.40
codegen_flags: <defaults>
</compile_context>

<pallas_src>
import functools

import jax
import jax.numpy as jnp
import numpy as np
from jax.experimental import pallas as pl
from jax.experimental.pallas import tpu as pltpu


def _pick_tp(HW, H, W, N):
    """Output-pixel chunk width: lane-dense (multiple of 128 when possible), divides HW, and
    keeps the per-step f32 temporaries (A, B, stage-1 product, out) within ~2 MiB so the
    tiling is portable to v7x's smaller (64 MiB) VMEM."""
    budget = 2 * 1024 * 1024
    per_col = 4 * (W + H + N * H + 4 * N)          # f32 bytes of live temporaries per column
    cap = max(128, budget // per_col)
    best = None
    tp = 128
    while tp <= min(HW, cap):
        if HW % tp == 0:
            best = tp
        tp += 128
    return best if best is not None else HW        # small / irregular spatial: single chunk


def _affine_sample_kernel(theta_ref, base_ref, xm_ref, o_ref, *, H, W, N, TP, OCG):
    """grid = (channel_group, p_chunk).

    theta_ref: SMEM (OC*6,) f32     flattened 2x3 affine matrices
    base_ref:  VMEM (2, TP)  f32    row 0: normalized x, row 1: normalized y (this p-chunk)
    xm_ref:    VMEM (N*H, W) f32    channel-mean image (grid-resident, single-buffered)
    o_ref:     VMEM (OCG, N, TP)    output columns for this (channel-group, p-chunk)
    """
    g = pl.program_id(0)

    # ---- channel-independent work, hoisted out of the per-channel loop ----
    xs = base_ref[0:1, :]                                         # (1, TP)
    ys = base_ref[1:2, :]                                         # (1, TP)
    riW = jax.lax.broadcasted_iota(jnp.int32, (W, TP), 0)         # input column index grid
    riH = jax.lax.broadcasted_iota(jnp.int32, (H, TP), 0)         # input row index grid
    xm = xm_ref[...]                                              # (N*H, W)

    half_w = 0.5 * float(W - 1)        # grid_sample unnormalization (align_corners=True)
    half_h = 0.5 * float(H - 1)        # == 0 for degenerate dims -> coord pinned to 0

    def axis_weights(coord, size, ri):
        """Separable 1-D bilinear weights, shape (size, TP), 'zeros' padding folded in.
        The 2-D in-bounds condition factorizes per axis, so masking each axis is exact."""
        c0f = jnp.floor(coord)
        w1 = coord - c0f
        w0 = 1.0 - w1
        c1f = c0f + 1.0
        last = float(size - 1)
        in0 = ((c0f >= 0.0) & (c0f <= last)).astype(jnp.float32)
        in1 = ((c1f >= 0.0) & (c1f <= last)).astype(jnp.float32)
        # Clamp before the int cast: extreme coords never hit an implementation-defined
        # float->int conversion; clamped values (-1, size) never match a valid index and
        # their weights are zeroed by in0/in1 anyway.
        c0 = jnp.clip(c0f, -1.0, float(size)).astype(jnp.int32)
        c1 = jnp.clip(c1f, -1.0, float(size)).astype(jnp.int32)
        return ((ri == c0).astype(jnp.float32) * (w0 * in0) +
                (ri == c1).astype(jnp.float32) * (w1 * in1))

    def one_channel(c):
        tbase = (g * OCG + c) * 6
        t00 = theta_ref[tbase + 0]; t01 = theta_ref[tbase + 1]; t02 = theta_ref[tbase + 2]
        t10 = theta_ref[tbase + 3]; t11 = theta_ref[tbase + 4]; t12 = theta_ref[tbase + 5]

        # affine_grid, then grid_sample unnormalization (align_corners=True)
        ix = (t00 * xs + t01 * ys + t02 + 1.0) * half_w           # (1, TP)
        iy = (t10 * xs + t11 * ys + t12 + 1.0) * half_h           # (1, TP)

        A = axis_weights(ix, W, riW)                              # (W, TP) column (x) weights
        B = axis_weights(iy, H, riH)                              # (H, TP) row    (y) weights

        # stage 1: contract input columns on the MXU: (N*H, W) @ (W, TP) -> (N*H, TP)
        tmp = jnp.dot(xm, A, preferred_element_type=jnp.float32)
        # stage 2: weight input rows and reduce over H (VPU mul + XLU sublane reduce)
        out = (tmp.reshape(N, H, TP) * B[None, :, :]).sum(axis=1)  # (N, TP)
        o_ref[c, :, :] = out.astype(o_ref.dtype)

    def body(c, carry):
        one_channel(c)
        return carry

    jax.lax.fori_loop(0, OCG, body, 0, unroll=True)


def affine_net_forward(x, theta):
    """x: (N, C, H, W), theta: (OC, 1, 2, 3) -> (N, OC, H, W)   (agg='mean')."""
    N, C, H, W = x.shape
    OC = theta.shape[0]
    HW = H * W
    TP = _pick_tp(HW, H, W, N)
    n_pt = HW // TP

    # Keep a parallel grid axis of extent >= 2 when possible (v7x has 2 TensorCores).
    if n_pt >= 2 or OC < 2 or OC % 2 != 0:
        n_g, OCG = 1, OC
    else:
        n_g, OCG = 2, OC // 2

    theta_flat = theta.reshape(OC * 6).astype(jnp.float32)
    # Hoisted channel mean: exact for agg='mean' (the mean commutes with the linear sampling).
    # TODO(synk): for very large N*HW the resident xm block should itself be row-tiled.
    xm = x.astype(jnp.float32).mean(axis=1).reshape(N * H, W)

    # Normalized align_corners=True base grid as a tiny compile-time constant:
    # row 0 = x coord of every flat output pixel, row 1 = y coord.  No in-kernel div/mod.
    xs1 = np.linspace(-1.0, 1.0, W, dtype=np.float32)
    ys1 = np.linspace(-1.0, 1.0, H, dtype=np.float32)
    base = jnp.asarray(np.stack([np.tile(xs1, H), np.repeat(ys1, W)], axis=0))  # (2, HW)

    kernel = functools.partial(_affine_sample_kernel, H=H, W=W, N=N, TP=TP, OCG=OCG)

    def build(single_buffer_xm):
        xm_kwargs = {"pipeline_mode": pl.Buffered(1)} if single_buffer_xm else {}
        return pl.pallas_call(
            kernel,
            grid=(n_g, n_pt),
            in_specs=[
                pl.BlockSpec(memory_space=pltpu.MemorySpace.SMEM),            # theta scalars
                pl.BlockSpec((2, TP), lambda g, pt: (0, pt)),                 # base grid chunk
                pl.BlockSpec((N * H, W), lambda g, pt: (0, 0), **xm_kwargs),  # resident mean img
            ],
            out_specs=pl.BlockSpec((OCG, N, TP), lambda g, pt: (g, 0, pt)),
            out_shape=jax.ShapeDtypeStruct((OC, N, HW), x.dtype),
            compiler_params=pltpu.CompilerParams(
                dimension_semantics=("parallel", "parallel")),
        )

    try:
        out = build(True)(theta_flat, base, xm)
    except Exception:
        # pipeline_mode=pl.Buffered(1) not supported for top-level pallas_call on this jax
        # version -> fall back to default (double) buffering of the tiny resident xm block.
        out = build(False)(theta_flat, base, xm)

    # Tiny layout fixup outside the kernel (negligible at these sizes).
    # TODO(synk): at large N/OC, restructure the output layout to avoid this transpose and the
    # N<8 masked-sublane stores (per review note on writeback cost).
    return out.transpose(1, 0, 2).reshape(N, OC, H, W)


def affine_net_reference(x, theta):
    """Pure-JAX reference replicating torch affine_grid + grid_sample(bilinear, zeros, ac=True)."""
    N, C, H, W = x.shape
    OC = theta.shape[0]
    ys = jnp.linspace(-1.0, 1.0, H)
    xs = jnp.linspace(-1.0, 1.0, W)
    yy, xx = jnp.meshgrid(ys, xs, indexing="ij")
    outs = []
    for ch in range(OC):
        t = theta[ch, 0]
        gx = t[0, 0] * xx + t[0, 1] * yy + t[0, 2]
        gy = t[1, 0] * xx + t[1, 1] * yy + t[1, 2]
        ix = (gx + 1.0) * 0.5 * (W - 1)
        iy = (gy + 1.0) * 0.5 * (H - 1)
        x0 = jnp.floor(ix)
        y0 = jnp.floor(iy)

        def samp(xi, yi):
            inb = (xi >= 0) & (xi <= W - 1) & (yi >= 0) & (yi <= H - 1)
            xc = jnp.clip(xi, 0, W - 1).astype(jnp.int32)
            yc = jnp.clip(yi, 0, H - 1).astype(jnp.int32)
            return x[:, :, yc, xc] * inb[None, None].astype(x.dtype)

        wx1 = ix - x0
        wx0 = 1.0 - wx1
        wy1 = iy - y0
        wy0 = 1.0 - wy1
        o = (samp(x0, y0) * wx0 * wy0 + samp(x0 + 1.0, y0) * wx1 * wy0 +
             samp(x0, y0 + 1.0) * wx0 * wy1 + samp(x0 + 1.0, y0 + 1.0) * wx1 * wy1)
        outs.append(o)
    return jnp.stack(outs, 1).mean(axis=2)


if __name__ == "__main__":
    key = jax.random.PRNGKey(0)
    k_x, k_t = jax.random.split(key)

    N, C, H, W = 2, 4, 16, 16
    out_channels = 4

    x = jax.random.normal(k_x, (N, C, H, W), dtype=jnp.float32)
    # parameter shape matches nn.Parameter(torch.randn((out_channels, 1, 2, 3)))
    theta = jax.random.normal(k_t, (out_channels, 1, 2, 3), dtype=jnp.float32)

    out = jax.block_until_ready(affine_net_forward(x, theta))
    assert out.shape == (N, out_channels, H, W), out.shape

    ref = jax.block_until_ready(affine_net_reference(x, theta))
    np.testing.assert_allclose(np.asarray(out), np.asarray(ref), atol=1e-3, rtol=1e-3)

    print("KERNEL_OK")
</pallas_src>

<mosaic_0001>
module attributes {stable_mosaic.version = 11 : i64} {
  func.func @_affine_sample_kernel(%arg0: i32, %arg1: i32, %arg2: memref<24xf32, #tpu.memory_space<smem>>, %arg3: memref<2x256xf32, #tpu.memory_space<vmem>>, %arg4: memref<32x16xf32, #tpu.memory_space<vmem>>, %arg5: memref<2x2x256xf32, #tpu.memory_space<vmem>>) attributes {dimension_semantics = [#tpu.dimension_semantics<parallel>, #tpu.dimension_semantics<parallel>], iteration_bounds = array<i64: 2, 1>, scalar_prefetch = 0 : i64, scratch_operands = 0 : i64, tpu.core_type = #tpu.core_type<tc>, window_params = [{transform_indices = @transform_0, window_bounds = array<i64: 24>}, {transform_indices = @transform_1, window_bounds = array<i64: 2, 256>}, {pipeline_mode = #tpu.pipeline_mode<synchronous>, transform_indices = @transform_2, window_bounds = array<i64: 32, 16>}, {transform_indices = @transform_3, window_bounds = array<i64: 2, 2, 256>}]} {
    %c0 = arith.constant 0 : index
    %c0_0 = arith.constant 0 : index
    %0 = vector.load %arg3[%c0, %c0_0] : memref<2x256xf32, #tpu.memory_space<vmem>>, vector<1x256xf32>
    %c1 = arith.constant 1 : index
    %c0_1 = arith.constant 0 : index
    %1 = vector.load %arg3[%c1, %c0_1] : memref<2x256xf32, #tpu.memory_space<vmem>>, vector<1x256xf32>
    %2 = tpu.iota {dimensions = array<i32: 0>} : vector<16x256xi32>
    %3 = tpu.iota {dimensions = array<i32: 0>} : vector<16x256xi32>
    %c0_2 = arith.constant 0 : index
    %c0_3 = arith.constant 0 : index
    %4 = vector.load %arg4[%c0_2, %c0_3] : memref<32x16xf32, #tpu.memory_space<vmem>>, vector<32x16xf32>
    %c0_i32 = arith.constant 0 : i32
    %c2_i32 = arith.constant 2 : i32
    %5 = arith.muli %arg0, %c2_i32 : i32
    %6 = arith.addi %5, %c0_i32 : i32
    %c6_i32 = arith.constant 6 : i32
    %7 = arith.muli %6, %c6_i32 : i32
    %c0_i32_4 = arith.constant 0 : i32
    %8 = arith.addi %7, %c0_i32_4 : i32
    %9 = arith.index_cast %8 : i32 to index
    %10 = memref.load %arg2[%9] : memref<24xf32, #tpu.memory_space<smem>>
    %c1_i32 = arith.constant 1 : i32
    %11 = arith.addi %7, %c1_i32 : i32
    %12 = arith.index_cast %11 : i32 to index
    %13 = memref.load %arg2[%12] : memref<24xf32, #tpu.memory_space<smem>>
    %c2_i32_5 = arith.constant 2 : i32
    %14 = arith.addi %7, %c2_i32_5 : i32
    %15 = arith.index_cast %14 : i32 to index
    %16 = memref.load %arg2[%15] : memref<24xf32, #tpu.memory_space<smem>>
    %c3_i32 = arith.constant 3 : i32
    %17 = arith.addi %7, %c3_i32 : i32
    %18 = arith.index_cast %17 : i32 to index
    %19 = memref.load %arg2[%18] : memref<24xf32, #tpu.memory_space<smem>>
    %c4_i32 = arith.constant 4 : i32
    %20 = arith.addi %7, %c4_i32 : i32
    %21 = arith.index_cast %20 : i32 to index
    %22 = memref.load %arg2[%21] : memref<24xf32, #tpu.memory_space<smem>>
    %c5_i32 = arith.constant 5 : i32
    %23 = arith.addi %7, %c5_i32 : i32
    %24 = arith.index_cast %23 : i32 to index
    %25 = memref.load %arg2[%24] : memref<24xf32, #tpu.memory_space<smem>>
    %26 = vector.broadcast %10 : f32 to vector<1x256xf32>
    %27 = arith.mulf %26, %0 : vector<1x256xf32>
    %28 = vector.broadcast %13 : f32 to vector<1x256xf32>
    %29 = arith.mulf %28, %1 : vector<1x256xf32>
    %30 = arith.addf %27, %29 : vector<1x256xf32>
    %31 = vector.broadcast %16 : f32 to vector<1x256xf32>
    %32 = arith.addf %30, %31 : vector<1x256xf32>
    %cst = arith.constant 1.000000e+00 : f32
    %33 = vector.broadcast %cst : f32 to vector<1x256xf32>
    %34 = arith.addf %32, %33 : vector<1x256xf32>
    %cst_6 = arith.constant 7.500000e+00 : f32
    %35 = vector.broadcast %cst_6 : f32 to vector<1x256xf32>
    %36 = arith.mulf %34, %35 : vector<1x256xf32>
    %37 = vector.broadcast %19 : f32 to vector<1x256xf32>
    %38 = arith.mulf %37, %0 : vector<1x256xf32>
    %39 = vector.broadcast %22 : f32 to vector<1x256xf32>
    %40 = arith.mulf %39, %1 : vector<1x256xf32>
    %41 = arith.addf %38, %40 : vector<1x256xf32>
    %42 = vector.broadcast %25 : f32 to vector<1x256xf32>
    %43 = arith.addf %41, %42 : vector<1x256xf32>
    %cst_7 = arith.constant 1.000000e+00 : f32
    %44 = vector.broadcast %cst_7 : f32 to vector<1x256xf32>
    %45 = arith.addf %43, %44 : vector<1x256xf32>
    %cst_8 = arith.constant 7.500000e+00 : f32
    %46 = vector.broadcast %cst_8 : f32 to vector<1x256xf32>
    %47 = arith.mulf %45, %46 : vector<1x256xf32>
    %48 = math.floor %36 : vector<1x256xf32>
    %49 = arith.subf %36, %48 : vector<1x256xf32>
    %cst_9 = arith.constant 1.000000e+00 : f32
    %50 = vector.broadcast %cst_9 : f32 to vector<1x256xf32>
    %51 = arith.subf %50, %49 : vector<1x256xf32>
    %cst_10 = arith.constant 1.000000e+00 : f32
    %52 = vector.broadcast %cst_10 : f32 to vector<1x256xf32>
    %53 = arith.addf %48, %52 : vector<1x256xf32>
    %cst_11 = arith.constant 0.000000e+00 : f32
    %54 = vector.broadcast %cst_11 : f32 to vector<1x256xf32>
    %55 = arith.cmpf oge, %48, %54 : vector<1x256xf32>
    %cst_12 = arith.constant 1.500000e+01 : f32
    %56 = vector.broadcast %cst_12 : f32 to vector<1x256xf32>
    %57 = arith.cmpf ole, %48, %56 : vector<1x256xf32>
    %58 = arith.andi %55, %57 : vector<1x256xi1>
    %59 = arith.extui %58 : vector<1x256xi1> to vector<1x256xi32>
    %60 = arith.sitofp %59 : vector<1x256xi32> to vector<1x256xf32>
    %cst_13 = arith.constant 0.000000e+00 : f32
    %61 = vector.broadcast %cst_13 : f32 to vector<1x256xf32>
    %62 = arith.cmpf oge, %53, %61 : vector<1x256xf32>
    %cst_14 = arith.constant 1.500000e+01 : f32
    %63 = vector.broadcast %cst_14 : f32 to vector<1x256xf32>
    %64 = arith.cmpf ole, %53, %63 : vector<1x256xf32>
    %65 = arith.andi %62, %64 : vector<1x256xi1>
    %66 = arith.extui %65 : vector<1x256xi1> to vector<1x256xi32>
    %67 = arith.sitofp %66 : vector<1x256xi32> to vector<1x256xf32>
    %cst_15 = arith.constant -1.000000e+00 : f32
    %cst_16 = arith.constant 1.600000e+01 : f32
    %68 = vector.broadcast %cst_15 : f32 to vector<1x256xf32>
    %69 = arith.maximumf %68, %48 : vector<1x256xf32>
    %70 = vector.broadcast %cst_16 : f32 to vector<1x256xf32>
    %71 = arith.minimumf %70, %69 : vector<1x256xf32>
    %72 = arith.fptosi %71 : vector<1x256xf32> to vector<1x256xi32>
    %cst_17 = arith.constant -1.000000e+00 : f32
    %cst_18 = arith.constant 1.600000e+01 : f32
    %73 = vector.broadcast %cst_17 : f32 to vector<1x256xf32>
    %74 = arith.maximumf %73, %53 : vector<1x256xf32>
    %75 = vector.broadcast %cst_18 : f32 to vector<1x256xf32>
    %76 = arith.minimumf %75, %74 : vector<1x256xf32>
    %77 = arith.fptosi %76 : vector<1x256xf32> to vector<1x256xi32>
    %78 = vector.broadcast %72 : vector<1x256xi32> to vector<16x256xi32>
    %79 = arith.cmpi eq, %2, %78 : vector<16x256xi32>
    %80 = arith.extui %79 : vector<16x256xi1> to vector<16x256xi32>
    %81 = arith.sitofp %80 : vector<16x256xi32> to vector<16x256xf32>
    %82 = arith.mulf %51, %60 : vector<1x256xf32>
    %83 = vector.broadcast %82 : vector<1x256xf32> to vector<16x256xf32>
    %84 = arith.mulf %81, %83 : vector<16x256xf32>
    %85 = vector.broadcast %77 : vector<1x256xi32> to vector<16x256xi32>
    %86 = arith.cmpi eq, %2, %85 : vector<16x256xi32>
    %87 = arith.extui %86 : vector<16x256xi1> to vector<16x256xi32>
    %88 = arith.sitofp %87 : vector<16x256xi32> to vector<16x256xf32>
    %89 = arith.mulf %49, %67 : vector<1x256xf32>
    %90 = vector.broadcast %89 : vector<1x256xf32> to vector<16x256xf32>
    %91 = arith.mulf %88, %90 : vector<16x256xf32>
    %92 = arith.addf %84, %91 : vector<16x256xf32>
    %93 = math.floor %47 : vector<1x256xf32>
    %94 = arith.subf %47, %93 : vector<1x256xf32>
    %cst_19 = arith.constant 1.000000e+00 : f32
    %95 = vector.broadcast %cst_19 : f32 to vector<1x256xf32>
    %96 = arith.subf %95, %94 : vector<1x256xf32>
    %cst_20 = arith.constant 1.000000e+00 : f32
    %97 = vector.broadcast %cst_20 : f32 to vector<1x256xf32>
    %98 = arith.addf %93, %97 : vector<1x256xf32>
    %cst_21 = arith.constant 0.000000e+00 : f32
    %99 = vector.broadcast %cst_21 : f32 to vector<1x256xf32>
    %100 = arith.cmpf oge, %93, %99 : vector<1x256xf32>
    %cst_22 = arith.constant 1.500000e+01 : f32
    %101 = vector.broadcast %cst_22 : f32 to vector<1x256xf32>
    %102 = arith.cmpf ole, %93, %101 : vector<1x256xf32>
    %103 = arith.andi %100, %102 : vector<1x256xi1>
    %104 = arith.extui %103 : vector<1x256xi1> to vector<1x256xi32>
    %105 = arith.sitofp %104 : vector<1x256xi32> to vector<1x256xf32>
    %cst_23 = arith.constant 0.000000e+00 : f32
    %106 = vector.broadcast %cst_23 : f32 to vector<1x256xf32>
    %107 = arith.cmpf oge, %98, %106 : vector<1x256xf32>
    %cst_24 = arith.constant 1.500000e+01 : f32
    %108 = vector.broadcast %cst_24 : f32 to vector<1x256xf32>
    %109 = arith.cmpf ole, %98, %108 : vector<1x256xf32>
    %110 = arith.andi %107, %109 : vector<1x256xi1>
    %111 = arith.extui %110 : vector<1x256xi1> to vector<1x256xi32>
    %112 = arith.sitofp %111 : vector<1x256xi32> to vector<1x256xf32>
    %cst_25 = arith.constant -1.000000e+00 : f32
    %cst_26 = arith.constant 1.600000e+01 : f32
    %113 = vector.broadcast %cst_25 : f32 to vector<1x256xf32>
    %114 = arith.maximumf %113, %93 : vector<1x256xf32>
    %115 = vector.broadcast %cst_26 : f32 to vector<1x256xf32>
    %116 = arith.minimumf %115, %114 : vector<1x256xf32>
    %117 = arith.fptosi %116 : vector<1x256xf32> to vector<1x256xi32>
    %cst_27 = arith.constant -1.000000e+00 : f32
    %cst_28 = arith.constant 1.600000e+01 : f32
    %118 = vector.broadcast %cst_27 : f32 to vector<1x256xf32>
    %119 = arith.maximumf %118, %98 : vector<1x256xf32>
    %120 = vector.broadcast %cst_28 : f32 to vector<1x256xf32>
    %121 = arith.minimumf %120, %119 : vector<1x256xf32>
    %122 = arith.fptosi %121 : vector<1x256xf32> to vector<1x256xi32>
    %123 = vector.broadcast %117 : vector<1x256xi32> to vector<16x256xi32>
    %124 = arith.cmpi eq, %3, %123 : vector<16x256xi32>
    %125 = arith.extui %124 : vector<16x256xi1> to vector<16x256xi32>
    %126 = arith.sitofp %125 : vector<16x256xi32> to vector<16x256xf32>
    %127 = arith.mulf %96, %105 : vector<1x256xf32>
    %128 = vector.broadcast %127 : vector<1x256xf32> to vector<16x256xf32>
    %129 = arith.mulf %126, %128 : vector<16x256xf32>
    %130 = vector.broadcast %122 : vector<1x256xi32> to vector<16x256xi32>
    %131 = arith.cmpi eq, %3, %130 : vector<16x256xi32>
    %132 = arith.extui %131 : vector<16x256xi1> to vector<16x256xi32>
    %133 = arith.sitofp %132 : vector<16x256xi32> to vector<16x256xf32>
    %134 = arith.mulf %94, %112 : vector<1x256xf32>
    %135 = vector.broadcast %134 : vector<1x256xf32> to vector<16x256xf32>
    %136 = arith.mulf %133, %135 : vector<16x256xf32>
    %137 = arith.addf %129, %136 : vector<16x256xf32>
    %cst_29 = arith.constant dense<0.000000e+00> : vector<32x256xf32>
    %138 = tpu.matmul %4, %92, %cst_29 {dimension_numbers = #tpu.dot_dimension_numbers<[1], [0], [0], [1], [0, 0, 1, 1], [], []>} : vector<32x16xf32>, vector<16x256xf32>, vector<32x256xf32> -> vector<32x256xf32>
    %139 = vector.shape_cast %138 : vector<32x256xf32> to vector<2x16x256xf32>
    %140 = vector.shape_cast %137 : vector<16x256xf32> to vector<1x16x256xf32>
    %141 = vector.broadcast %140 : vector<1x16x256xf32> to vector<2x16x256xf32>
    %142 = arith.mulf %139, %141 : vector<2x16x256xf32>
    %cst_30 = arith.constant dense<0.000000e+00> : vector<2x256xf32>
    %143 = vector.multi_reduction <add>, %142, %cst_30 [1] : vector<2x16x256xf32> to vector<2x256xf32>
    %144 = arith.index_cast %c0_i32 : i32 to index
    %c0_31 = arith.constant 0 : index
    %c0_32 = arith.constant 0 : index
    %145 = vector.load %arg5[%144, %c0_31, %c0_32] : memref<2x2x256xf32, #tpu.memory_space<vmem>>, vector<1x2x256xf32>
    %146 = vector.shape_cast %145 : vector<1x2x256xf32> to vector<2x256xf32>
    %147 = vector.shape_cast %143 : vector<2x256xf32> to vector<1x2x256xf32>
    tpu.vector_store %arg5[%144, %c0_31, %c0_32], %147 {strides = array<i32>} : memref<2x2x256xf32, #tpu.memory_space<vmem>>, vector<1x2x256xf32>,
    %c1_i32_33 = arith.constant 1 : i32
    %c2_i32_34 = arith.constant 2 : i32
    %148 = arith.muli %arg0, %c2_i32_34 : i32
    %149 = arith.addi %148, %c1_i32_33 : i32
    %c6_i32_35 = arith.constant 6 : i32
    %150 = arith.muli %149, %c6_i32_35 : i32
    %c0_i32_36 = arith.constant 0 : i32
    %151 = arith.addi %150, %c0_i32_36 : i32
    %152 = arith.index_cast %151 : i32 to index
    %153 = memref.load %arg2[%152] : memref<24xf32, #tpu.memory_space<smem>>
    %c1_i32_37 = arith.constant 1 : i32
    %154 = arith.addi %150, %c1_i32_37 : i32
    %155 = arith.index_cast %154 : i32 to index
    %156 = memref.load %arg2[%155] : memref<24xf32, #tpu.memory_space<smem>>
    %c2_i32_38 = arith.constant 2 : i32
    %157 = arith.addi %150, %c2_i32_38 : i32
    %158 = arith.index_cast %157 : i32 to index
    %159 = memref.load %arg2[%158] : memref<24xf32, #tpu.memory_space<smem>>
    %c3_i32_39 = arith.constant 3 : i32
    %160 = arith.addi %150, %c3_i32_39 : i32
    %161 = arith.index_cast %160 : i32 to index
    %162 = memref.load %arg2[%161] : memref<24xf32, #tpu.memory_space<smem>>
    %c4_i32_40 = arith.constant 4 : i32
    %163 = arith.addi %150, %c4_i32_40 : i32
    %164 = arith.index_cast %163 : i32 to index
    %165 = memref.load %arg2[%164] : memref<24xf32, #tpu.memory_space<smem>>
    %c5_i32_41 = arith.constant 5 : i32
    %166 = arith.addi %150, %c5_i32_41 : i32
    %167 = arith.index_cast %166 : i32 to index
    %168 = memref.load %arg2[%167] : memref<24xf32, #tpu.memory_space<smem>>
    %169 = vector.broadcast %153 : f32 to vector<1x256xf32>
    %170 = arith.mulf %169, %0 : vector<1x256xf32>
    %171 = vector.broadcast %156 : f32 to vector<1x256xf32>
    %172 = arith.mulf %171, %1 : vector<1x256xf32>
    %173 = arith.addf %170, %172 : vector<1x256xf32>
    %174 = vector.broadcast %159 : f32 to vector<1x256xf32>
    %175 = arith.addf %173, %174 : vector<1x256xf32>
    %cst_42 = arith.constant 1.000000e+00 : f32
    %176 = vector.broadcast %cst_42 : f32 to vector<1x256xf32>
    %177 = arith.addf %175, %176 : vector<1x256xf32>
    %cst_43 = arith.constant 7.500000e+00 : f32
    %178 = vector.broadcast %cst_43 : f32 to vector<1x256xf32>
    %179 = arith.mulf %177, %178 : vector<1x256xf32>
    %180 = vector.broadcast %162 : f32 to vector<1x256xf32>
    %181 = arith.mulf %180, %0 : vector<1x256xf32>
    %182 = vector.broadcast %165 : f32 to vector<1x256xf32>
    %183 = arith.mulf %182, %1 : vector<1x256xf32>
    %184 = arith.addf %181, %183 : vector<1x256xf32>
    %185 = vector.broadcast %168 : f32 to vector<1x256xf32>
    %186 = arith.addf %184, %185 : vector<1x256xf32>
    %cst_44 = arith.constant 1.000000e+00 : f32
    %187 = vector.broadcast %cst_44 : f32 to vector<1x256xf32>
    %188 = arith.addf %186, %187 : vector<1x256xf32>
    %cst_45 = arith.constant 7.500000e+00 : f32
    %189 = vector.broadcast %cst_45 : f32 to vector<1x256xf32>
    %190 = arith.mulf %188, %189 : vector<1x256xf32>
    %191 = math.floor %179 : vector<1x256xf32>
    %192 = arith.subf %179, %191 : vector<1x256xf32>
    %cst_46 = arith.constant 1.000000e+00 : f32
    %193 = vector.broadcast %cst_46 : f32 to vector<1x256xf32>
    %194 = arith.subf %193, %192 : vector<1x256xf32>
    %cst_47 = arith.constant 1.000000e+00 : f32
    %195 = vector.broadcast %cst_47 : f32 to vector<1x256xf32>
    %196 = arith.addf %191, %195 : vector<1x256xf32>
    %cst_48 = arith.constant 0.000000e+00 : f32
    %197 = vector.broadcast %cst_48 : f32 to vector<1x256xf32>
    %198 = arith.cmpf oge, %191, %197 : vector<1x256xf32>
    %cst_49 = arith.constant 1.500000e+01 : f32
    %199 = vector.broadcast %cst_49 : f32 to vector<1x256xf32>
    %200 = arith.cmpf ole, %191, %199 : vector<1x256xf32>
    %201 = arith.andi %198, %200 : vector<1x256xi1>
    %202 = arith.extui %201 : vector<1x256xi1> to vector<1x256xi32>
    %203 = arith.sitofp %202 : vector<1x256xi32> to vector<1x256xf32>
    %cst_50 = arith.constant 0.000000e+00 : f32
    %204 = vector.broadcast %cst_50 : f32 to vector<1x256xf32>
    %205 = arith.cmpf oge, %196, %204 : vector<1x256xf32>
    %cst_51 = arith.constant 1.500000e+01 : f32
    %206 = vector.broadcast %cst_51 : f32 to vector<1x256xf32>
    %207 = arith.cmpf ole, %196, %206 : vector<1x256xf32>
    %208 = arith.andi %205, %207 : vector<1x256xi1>
    %209 = arith.extui %208 : vector<1x256xi1> to vector<1x256xi32>
    %210 = arith.sitofp %209 : vector<1x256xi32> to vector<1x256xf32>
    %cst_52 = arith.constant -1.000000e+00 : f32
    %cst_53 = arith.constant 1.600000e+01 : f32
    %211 = vector.broadcast %cst_52 : f32 to vector<1x256xf32>
    %212 = arith.maximumf %211, %191 : vector<1x256xf32>
    %213 = vector.broadcast %cst_53 : f32 to vector<1x256xf32>
    %214 = arith.minimumf %213, %212 : vector<1x256xf32>
    %215 = arith.fptosi %214 : vector<1x256xf32> to vector<1x256xi32>
    %cst_54 = arith.constant -1.000000e+00 : f32
    %cst_55 = arith.constant 1.600000e+01 : f32
    %216 = vector.broadcast %cst_54 : f32 to vector<1x256xf32>
    %217 = arith.maximumf %216, %196 : vector<1x256xf32>
    %218 = vector.broadcast %cst_55 : f32 to vector<1x256xf32>
    %219 = arith.minimumf %218, %217 : vector<1x256xf32>
    %220 = arith.fptosi %219 : vector<1x256xf32> to vector<1x256xi32>
    %221 = vector.broadcast %215 : vector<1x256xi32> to vector<16x256xi32>
    %222 = arith.cmpi eq, %2, %221 : vector<16x256xi32>
    %223 = arith.extui %222 : vector<16x256xi1> to vector<16x256xi32>
    %224 = arith.sitofp %223 : vector<16x256xi32> to vector<16x256xf32>
    %225 = arith.mulf %194, %203 : vector<1x256xf32>
    %226 = vector.broadcast %225 : vector<1x256xf32> to vector<16x256xf32>
    %227 = arith.mulf %224, %226 : vector<16x256xf32>
    %228 = vector.broadcast %220 : vector<1x256xi32> to vector<16x256xi32>
    %229 = arith.cmpi eq, %2, %228 : vector<16x256xi32>
    %230 = arith.extui %229 : vector<16x256xi1> to vector<16x256xi32>
    %231 = arith.sitofp %230 : vector<16x256xi32> to vector<16x256xf32>
    %232 = arith.mulf %192, %210 : vector<1x256xf32>
    %233 = vector.broadcast %232 : vector<1x256xf32> to vector<16x256xf32>
    %234 = arith.mulf %231, %233 : vector<16x256xf32>
    %235 = arith.addf %227, %234 : vector<16x256xf32>
    %236 = math.floor %190 : vector<1x256xf32>
    %237 = arith.subf %190, %236 : vector<1x256xf32>
    %cst_56 = arith.constant 1.000000e+00 : f32
    %238 = vector.broadcast %cst_56 : f32 to vector<1x256xf32>
    %239 = arith.subf %238, %237 : vector<1x256xf32>
    %cst_57 = arith.constant 1.000000e+00 : f32
    %240 = vector.broadcast %cst_57 : f32 to vector<1x256xf32>
    %241 = arith.addf %236, %240 : vector<1x256xf32>
    %cst_58 = arith.constant 0.000000e+00 : f32
    %242 = vector.broadcast %cst_58 : f32 to vector<1x256xf32>
    %243 = arith.cmpf oge, %236, %242 : vector<1x256xf32>
    %cst_59 = arith.constant 1.500000e+01 : f32
    %244 = vector.broadcast %cst_59 : f32 to vector<1x256xf32>
    %245 = arith.cmpf ole, %236, %244 : vector<1x256xf32>
    %246 = arith.andi %243, %245 : vector<1x256xi1>
    %247 = arith.extui %246 : vector<1x256xi1> to vector<1x256xi32>
    %248 = arith.sitofp %247 : vector<1x256xi32> to vector<1x256xf32>
    %cst_60 = arith.constant 0.000000e+00 : f32
    %249 = vector.broadcast %cst_60 : f32 to vector<1x256xf32>
    %250 = arith.cmpf oge, %241, %249 : vector<1x256xf32>
    %cst_61 = arith.constant 1.500000e+01 : f32
    %251 = vector.broadcast %cst_61 : f32 to vector<1x256xf32>
    %252 = arith.cmpf ole, %241, %251 : vector<1x256xf32>
    %253 = arith.andi %250, %252 : vector<1x256xi1>
    %254 = arith.extui %253 : vector<1x256xi1> to vector<1x256xi32>
    %255 = arith.sitofp %254 : vector<1x256xi32> to vector<1x256xf32>
    %cst_62 = arith.constant -1.000000e+00 : f32
    %cst_63 = arith.constant 1.600000e+01 : f32
    %256 = vector.broadcast %cst_62 : f32 to vector<1x256xf32>
    %257 = arith.maximumf %256, %236 : vector<1x256xf32>
    %258 = vector.broadcast %cst_63 : f32 to vector<1x256xf32>
    %259 = arith.minimumf %258, %257 : vector<1x256xf32>
    %260 = arith.fptosi %259 : vector<1x256xf32> to vector<1x256xi32>
    %cst_64 = arith.constant -1.000000e+00 : f32
    %cst_65 = arith.constant 1.600000e+01 : f32
    %261 = vector.broadcast %cst_64 : f32 to vector<1x256xf32>
    %262 = arith.maximumf %261, %241 : vector<1x256xf32>
    %263 = vector.broadcast %cst_65 : f32 to vector<1x256xf32>
    %264 = arith.minimumf %263, %262 : vector<1x256xf32>
    %265 = arith.fptosi %264 : vector<1x256xf32> to vector<1x256xi32>
    %266 = vector.broadcast %260 : vector<1x256xi32> to vector<16x256xi32>
    %267 = arith.cmpi eq, %3, %266 : vector<16x256xi32>
    %268 = arith.extui %267 : vector<16x256xi1> to vector<16x256xi32>
    %269 = arith.sitofp %268 : vector<16x256xi32> to vector<16x256xf32>
    %270 = arith.mulf %239, %248 : vector<1x256xf32>
    %271 = vector.broadcast %270 : vector<1x256xf32> to vector<16x256xf32>
    %272 = arith.mulf %269, %271 : vector<16x256xf32>
    %273 = vector.broadcast %265 : vector<1x256xi32> to vector<16x256xi32>
    %274 = arith.cmpi eq, %3, %273 : vector<16x256xi32>
    %275 = arith.extui %274 : vector<16x256xi1> to vector<16x256xi32>
    %276 = arith.sitofp %275 : vector<16x256xi32> to vector<16x256xf32>
    %277 = arith.mulf %237, %255 : vector<1x256xf32>
    %278 = vector.broadcast %277 : vector<1x256xf32> to vector<16x256xf32>
    %279 = arith.mulf %276, %278 : vector<16x256xf32>
    %280 = arith.addf %272, %279 : vector<16x256xf32>
    %cst_66 = arith.constant dense<0.000000e+00> : vector<32x256xf32>
    %281 = tpu.matmul %4, %235, %cst_66 {dimension_numbers = #tpu.dot_dimension_numbers<[1], [0], [0], [1], [0, 0, 1, 1], [], []>} : vector<32x16xf32>, vector<16x256xf32>, vector<32x256xf32> -> vector<32x256xf32>
    %282 = vector.shape_cast %281 : vector<32x256xf32> to vector<2x16x256xf32>
    %283 = vector.shape_cast %280 : vector<16x256xf32> to vector<1x16x256xf32>
    %284 = vector.broadcast %283 : vector<1x16x256xf32> to vector<2x16x256xf32>
    %285 = arith.mulf %282, %284 : vector<2x16x256xf32>
    %cst_67 = arith.constant dense<0.000000e+00> : vector<2x256xf32>
    %286 = vector.multi_reduction <add>, %285, %cst_67 [1] : vector<2x16x256xf32> to vector<2x256xf32>
    %287 = arith.index_cast %c1_i32_33 : i32 to index
    %c0_68 = arith.constant 0 : index
    %c0_69 = arith.constant 0 : index
    %288 = vector.load %arg5[%287, %c0_68, %c0_69] : memref<2x2x256xf32, #tpu.memory_space<vmem>>, vector<1x2x256xf32>
    %289 = vector.shape_cast %288 : vector<1x2x256xf32> to vector<2x256xf32>
    %290 = vector.shape_cast %286 : vector<2x256xf32> to vector<1x2x256xf32>
    tpu.vector_store %arg5[%287, %c0_68, %c0_69], %290 {strides = array<i32>} : memref<2x2x256xf32, #tpu.memory_space<vmem>>, vector<1x2x256xf32>,
    %c2_i32_70 = arith.constant 2 : i32
    return
  }
  func.func @transform_0(%arg0: i32, %arg1: i32) -> i32 {
    %c0_i32 = arith.constant 0 : i32
    %c0_i32_0 = arith.constant 0 : i32
    return %c0_i32 : i32
  }
  func.func @transform_1(%arg0: i32, %arg1: i32) -> (i32, i32) {
    %c0_i32 = arith.constant 0 : i32
    %c0_i32_0 = arith.constant 0 : i32
    return %c0_i32, %arg1 : i32, i32
  }
  func.func @transform_2(%arg0: i32, %arg1: i32) -> (i32, i32) {
    %c0_i32 = arith.constant 0 : i32
    %c0_i32_0 = arith.constant 0 : i32
    %c0_i32_1 = arith.constant 0 : i32
    return %c0_i32, %c0_i32_0 : i32, i32
  }
  func.func @transform_3(%arg0: i32, %arg1: i32) -> (i32, i32, i32) {
    %c0_i32 = arith.constant 0 : i32
    %c0_i32_0 = arith.constant 0 : i32
    return %arg0, %c0_i32, %arg1 : i32, i32, i32
  }
}

module attributes {stable_mosaic.version = 11 : i64} {
  func.func @_affine_sample_kernel(%arg0: i32, %arg1: i32, %arg2: memref<24xf32, #tpu.memory_space<smem>>, %arg3: memref<2x256xf32, #tpu.memory_space<vmem>>, %arg4: memref<32x16xf32, #tpu.memory_space<vmem>>, %arg5: memref<2x2x256xf32, #tpu.memory_space<vmem>>) attributes {dimension_semantics = [#tpu.dimension_semantics<parallel>, #tpu.dimension_semantics<parallel>], iteration_bounds = array<i64: 2, 1>, scalar_prefetch = 0 : i64, scratch_operands = 0 : i64, tpu.core_type = #tpu.core_type<tc>, window_params = [{transform_indices = @transform_0, window_bounds = array<i64: 24>}, {transform_indices = @transform_1, window_bounds = array<i64: 2, 256>}, {pipeline_mode = #tpu.pipeline_mode<synchronous>, transform_indices = @transform_2, window_bounds = array<i64: 32, 16>}, {transform_indices = @transform_3, window_bounds = array<i64: 2, 2, 256>}]} {
    %c0 = arith.constant 0 : index
    %c0_0 = arith.constant 0 : index
    %0 = vector.load %arg3[%c0, %c0_0] : memref<2x256xf32, #tpu.memory_space<vmem>>, vector<1x256xf32>
    %c1 = arith.constant 1 : index
    %c0_1 = arith.constant 0 : index
    %1 = vector.load %arg3[%c1, %c0_1] : memref<2x256xf32, #tpu.memory_space<vmem>>, vector<1x256xf32>
    %2 = tpu.iota {dimensions = array<i32: 0>} : vector<16x256xi32>
    %3 = tpu.iota {dimensions = array<i32: 0>} : vector<16x256xi32>
    %c0_2 = arith.constant 0 : index
    %c0_3 = arith.constant 0 : index
    %4 = vector.load %arg4[%c0_2, %c0_3] : memref<32x16xf32, #tpu.memory_space<vmem>>, vector<32x16xf32>
    %c0_i32 = arith.constant 0 : i32
    %c2_i32 = arith.constant 2 : i32
    %5 = arith.muli %arg0, %c2_i32 : i32
    %6 = arith.addi %5, %c0_i32 : i32
    %c6_i32 = arith.constant 6 : i32
    %7 = arith.muli %6, %c6_i32 : i32
    %c0_i32_4 = arith.constant 0 : i32
    %8 = arith.addi %7, %c0_i32_4 : i32
    %9 = arith.index_cast %8 : i32 to index
    %10 = memref.load %arg2[%9] : memref<24xf32, #tpu.memory_space<smem>>
    %c1_i32 = arith.constant 1 : i32
    %11 = arith.addi %7, %c1_i32 : i32
    %12 = arith.index_cast %11 : i32 to index
    %13 = memref.load %arg2[%12] : memref<24xf32, #tpu.memory_space<smem>>
    %c2_i32_5 = arith.constant 2 : i32
    %14 = arith.addi %7, %c2_i32_5 : i32
    %15 = arith.index_cast %14 : i32 to index
    %16 = memref.load %arg2[%15] : memref<24xf32, #tpu.memory_space<smem>>
    %c3_i32 = arith.constant 3 : i32
    %17 = arith.addi %7, %c3_i32 : i32
    %18 = arith.index_cast %17 : i32 to index
    %19 = memref.load %arg2[%18] : memref<24xf32, #tpu.memory_space<smem>>
    %c4_i32 = arith.constant 4 : i32
    %20 = arith.addi %7, %c4_i32 : i32
    %21 = arith.index_cast %20 : i32 to index
    %22 = memref.load %arg2[%21] : memref<24xf32, #tpu.memory_space<smem>>
    %c5_i32 = arith.constant 5 : i32
    %23 = arith.addi %7, %c5_i32 : i32
    %24 = arith.index_cast %23 : i32 to index
    %25 = memref.load %arg2[%24] : memref<24xf32, #tpu.memory_space<smem>>
    %26 = vector.broadcast %10 : f32 to vector<1x256xf32>
    %27 = arith.mulf %26, %0 : vector<1x256xf32>
    %28 = vector.broadcast %13 : f32 to vector<1x256xf32>
    %29 = arith.mulf %28, %1 : vector<1x256xf32>
    %30 = arith.addf %27, %29 : vector<1x256xf32>
    %31 = vector.broadcast %16 : f32 to vector<1x256xf32>
    %32 = arith.addf %30, %31 : vector<1x256xf32>
    %cst = arith.constant 1.000000e+00 : f32
    %33 = vector.broadcast %cst : f32 to vector<1x256xf32>
    %34 = arith.addf %32, %33 : vector<1x256xf32>
    %cst_6 = arith.constant 7.500000e+00 : f32
    %35 = vector.broadcast %cst_6 : f32 to vector<1x256xf32>
    %36 = arith.mulf %34, %35 : vector<1x256xf32>
    %37 = vector.broadcast %19 : f32 to vector<1x256xf32>
    %38 = arith.mulf %37, %0 : vector<1x256xf32>
    %39 = vector.broadcast %22 : f32 to vector<1x256xf32>
    %40 = arith.mulf %39, %1 : vector<1x256xf32>
    %41 = arith.addf %38, %40 : vector<1x256xf32>
    %42 = vector.broadcast %25 : f32 to vector<1x256xf32>
    %43 = arith.addf %41, %42 : vector<1x256xf32>
    %cst_7 = arith.constant 1.000000e+00 : f32
    %44 = vector.broadcast %cst_7 : f32 to vector<1x256xf32>
    %45 = arith.addf %43, %44 : vector<1x256xf32>
    %cst_8 = arith.constant 7.500000e+00 : f32
    %46 = vector.broadcast %cst_8 : f32 to vector<1x256xf32>
    %47 = arith.mulf %45, %46 : vector<1x256xf32>
    %48 = math.floor %36 : vector<1x256xf32>
    %49 = arith.subf %36, %48 : vector<1x256xf32>
    %cst_9 = arith.constant 1.000000e+00 : f32
    %50 = vector.broadcast %cst_9 : f32 to vector<1x256xf32>
    %51 = arith.subf %50, %49 : vector<1x256xf32>
    %cst_10 = arith.constant 1.000000e+00 : f32
    %52 = vector.broadcast %cst_10 : f32 to vector<1x256xf32>
    %53 = arith.addf %48, %52 : vector<1x256xf32>
    %cst_11 = arith.constant 0.000000e+00 : f32
    %54 = vector.broadcast %cst_11 : f32 to vector<1x256xf32>
    %55 = arith.cmpf oge, %48, %54 : vector<1x256xf32>
    %cst_12 = arith.constant 1.500000e+01 : f32
    %56 = vector.broadcast %cst_12 : f32 to vector<1x256xf32>
    %57 = arith.cmpf ole, %48, %56 : vector<1x256xf32>
    %58 = arith.andi %55, %57 : vector<1x256xi1>
    %59 = arith.extui %58 : vector<1x256xi1> to vector<1x256xi32>
    %60 = arith.sitofp %59 : vector<1x256xi32> to vector<1x256xf32>
    %cst_13 = arith.constant 0.000000e+00 : f32
    %61 = vector.broadcast %cst_13 : f32 to vector<1x256xf32>
    %62 = arith.cmpf oge, %53, %61 : vector<1x256xf32>
    %cst_14 = arith.constant 1.500000e+01 : f32
    %63 = vector.broadcast %cst_14 : f32 to vector<1x256xf32>
    %64 = arith.cmpf ole, %53, %63 : vector<1x256xf32>
    %65 = arith.andi %62, %64 : vector<1x256xi1>
    %66 = arith.extui %65 : vector<1x256xi1> to vector<1x256xi32>
    %67 = arith.sitofp %66 : vector<1x256xi32> to vector<1x256xf32>
    %cst_15 = arith.constant -1.000000e+00 : f32
    %cst_16 = arith.constant 1.600000e+01 : f32
    %68 = vector.broadcast %cst_15 : f32 to vector<1x256xf32>
    %69 = arith.maximumf %68, %48 : vector<1x256xf32>
    %70 = vector.broadcast %cst_16 : f32 to vector<1x256xf32>
    %71 = arith.minimumf %70, %69 : vector<1x256xf32>
    %72 = arith.fptosi %71 : vector<1x256xf32> to vector<1x256xi32>
    %cst_17 = arith.constant -1.000000e+00 : f32
    %cst_18 = arith.constant 1.600000e+01 : f32
    %73 = vector.broadcast %cst_17 : f32 to vector<1x256xf32>
    %74 = arith.maximumf %73, %53 : vector<1x256xf32>
    %75 = vector.broadcast %cst_18 : f32 to vector<1x256xf32>
    %76 = arith.minimumf %75, %74 : vector<1x256xf32>
    %77 = arith.fptosi %76 : vector<1x256xf32> to vector<1x256xi32>
    %78 = vector.broadcast %72 : vector<1x256xi32> to vector<16x256xi32>
    %79 = arith.cmpi eq, %2, %78 : vector<16x256xi32>
    %80 = arith.extui %79 : vector<16x256xi1> to vector<16x256xi32>
    %81 = arith.sitofp %80 : vector<16x256xi32> to vector<16x256xf32>
    %82 = arith.mulf %51, %60 : vector<1x256xf32>
    %83 = vector.broadcast %82 : vector<1x256xf32> to vector<16x256xf32>
    %84 = arith.mulf %81, %83 : vector<16x256xf32>
    %85 = vector.broadcast %77 : vector<1x256xi32> to vector<16x256xi32>
    %86 = arith.cmpi eq, %2, %85 : vector<16x256xi32>
    %87 = arith.extui %86 : vector<16x256xi1> to vector<16x256xi32>
    %88 = arith.sitofp %87 : vector<16x256xi32> to vector<16x256xf32>
    %89 = arith.mulf %49, %67 : vector<1x256xf32>
    %90 = vector.broadcast %89 : vector<1x256xf32> to vector<16x256xf32>
    %91 = arith.mulf %88, %90 : vector<16x256xf32>
    %92 = arith.addf %84, %91 : vector<16x256xf32>
    %93 = math.floor %47 : vector<1x256xf32>
    %94 = arith.subf %47, %93 : vector<1x256xf32>
    %cst_19 = arith.constant 1.000000e+00 : f32
    %95 = vector.broadcast %cst_19 : f32 to vector<1x256xf32>
    %96 = arith.subf %95, %94 : vector<1x256xf32>
    %cst_20 = arith.constant 1.000000e+00 : f32
    %97 = vector.broadcast %cst_20 : f32 to vector<1x256xf32>
    %98 = arith.addf %93, %97 : vector<1x256xf32>
    %cst_21 = arith.constant 0.000000e+00 : f32
    %99 = vector.broadcast %cst_21 : f32 to vector<1x256xf32>
    %100 = arith.cmpf oge, %93, %99 : vector<1x256xf32>
    %cst_22 = arith.constant 1.500000e+01 : f32
    %101 = vector.broadcast %cst_22 : f32 to vector<1x256xf32>
    %102 = arith.cmpf ole, %93, %101 : vector<1x256xf32>
    %103 = arith.andi %100, %102 : vector<1x256xi1>
    %104 = arith.extui %103 : vector<1x256xi1> to vector<1x256xi32>
    %105 = arith.sitofp %104 : vector<1x256xi32> to vector<1x256xf32>
    %cst_23 = arith.constant 0.000000e+00 : f32
    %106 = vector.broadcast %cst_23 : f32 to vector<1x256xf32>
    %107 = arith.cmpf oge, %98, %106 : vector<1x256xf32>
    %cst_24 = arith.constant 1.500000e+01 : f32
    %108 = vector.broadcast %cst_24 : f32 to vector<1x256xf32>
    %109 = arith.cmpf ole, %98, %108 : vector<1x256xf32>
    %110 = arith.andi %107, %109 : vector<1x256xi1>
    %111 = arith.extui %110 : vector<1x256xi1> to vector<1x256xi32>
    %112 = arith.sitofp %111 : vector<1x256xi32> to vector<1x256xf32>
    %cst_25 = arith.constant -1.000000e+00 : f32
    %cst_26 = arith.constant 1.600000e+01 : f32
    %113 = vector.broadcast %cst_25 : f32 to vector<1x256xf32>
    %114 = arith.maximumf %113, %93 : vector<1x256xf32>
    %115 = vector.broadcast %cst_26 : f32 to vector<1x256xf32>
    %116 = arith.minimumf %115, %114 : vector<1x256xf32>
    %117 = arith.fptosi %116 : vector<1x256xf32> to vector<1x256xi32>
    %cst_27 = arith.constant -1.000000e+00 : f32
    %cst_28 = arith.constant 1.600000e+01 : f32
    %118 = vector.broadcast %cst_27 : f32 to vector<1x256xf32>
    %119 = arith.maximumf %118, %98 : vector<1x256xf32>
    %120 = vector.broadcast %cst_28 : f32 to vector<1x256xf32>
    %121 = arith.minimumf %120, %119 : vector<1x256xf32>
    %122 = arith.fptosi %121 : vector<1x256xf32> to vector<1x256xi32>
    %123 = vector.broadcast %117 : vector<1x256xi32> to vector<16x256xi32>
    %124 = arith.cmpi eq, %3, %123 : vector<16x256xi32>
    %125 = arith.extui %124 : vector<16x256xi1> to vector<16x256xi32>
    %126 = arith.sitofp %125 : vector<16x256xi32> to vector<16x256xf32>
    %127 = arith.mulf %96, %105 : vector<1x256xf32>
    %128 = vector.broadcast %127 : vector<1x256xf32> to vector<16x256xf32>
    %129 = arith.mulf %126, %128 : vector<16x256xf32>
    %130 = vector.broadcast %122 : vector<1x256xi32> to vector<16x256xi32>
    %131 = arith.cmpi eq, %3, %130 : vector<16x256xi32>
    %132 = arith.extui %131 : vector<16x256xi1> to vector<16x256xi32>
    %133 = arith.sitofp %132 : vector<16x256xi32> to vector<16x256xf32>
    %134 = arith.mulf %94, %112 : vector<1x256xf32>
    %135 = vector.broadcast %134 : vector<1x256xf32> to vector<16x256xf32>
    %136 = arith.mulf %133, %135 : vector<16x256xf32>
    %137 = arith.addf %129, %136 : vector<16x256xf32>
    %cst_29 = arith.constant dense<0.000000e+00> : vector<32x256xf32>
    %138 = tpu.matmul %4, %92, %cst_29 {dimension_numbers = #tpu.dot_dimension_numbers<[1], [0], [0], [1], [0, 0, 1, 1], [], []>} : vector<32x16xf32>, vector<16x256xf32>, vector<32x256xf32> -> vector<32x256xf32>
    %139 = vector.shape_cast %138 : vector<32x256xf32> to vector<2x16x256xf32>
    %140 = vector.shape_cast %137 : vector<16x256xf32> to vector<1x16x256xf32>
    %141 = vector.broadcast %140 : vector<1x16x256xf32> to vector<2x16x256xf32>
    %142 = arith.mulf %139, %141 : vector<2x16x256xf32>
    %cst_30 = arith.constant dense<0.000000e+00> : vector<2x256xf32>
    %143 = vector.multi_reduction <add>, %142, %cst_30 [1] : vector<2x16x256xf32> to vector<2x256xf32>
    %144 = arith.index_cast %c0_i32 : i32 to index
    %c0_31 = arith.constant 0 : index
    %c0_32 = arith.constant 0 : index
    %145 = vector.load %arg5[%144, %c0_31, %c0_32] : memref<2x2x256xf32, #tpu.memory_space<vmem>>, vector<1x2x256xf32>
    %146 = vector.shape_cast %145 : vector<1x2x256xf32> to vector<2x256xf32>
    %147 = vector.shape_cast %143 : vector<2x256xf32> to vector<1x2x256xf32>
    tpu.vector_store %arg5[%144, %c0_31, %c0_32], %147 {strides = array<i32>} : memref<2x2x256xf32, #tpu.memory_space<vmem>>, vector<1x2x256xf32>,
    %c1_i32_33 = arith.constant 1 : i32
    %c2_i32_34 = arith.constant 2 : i32
    %148 = arith.muli %arg0, %c2_i32_34 : i32
    %149 = arith.addi %148, %c1_i32_33 : i32
    %c6_i32_35 = arith.constant 6 : i32
    %150 = arith.muli %149, %c6_i32_35 : i32
    %c0_i32_36 = arith.constant 0 : i32
    %151 = arith.addi %150, %c0_i32_36 : i32
    %152 = arith.index_cast %151 : i32 to index
    %153 = memref.load %arg2[%152] : memref<24xf32, #tpu.memory_space<smem>>
    %c1_i32_37 = arith.constant 1 : i32
    %154 = arith.addi %150, %c1_i32_37 : i32
    %155 = arith.index_cast %154 : i32 to index
    %156 = memref.load %arg2[%155] : memref<24xf32, #tpu.memory_space<smem>>
    %c2_i32_38 = arith.constant 2 : i32
    %157 = arith.addi %150, %c2_i32_38 : i32
    %158 = arith.index_cast %157 : i32 to index
    %159 = memref.load %arg2[%158] : memref<24xf32, #tpu.memory_space<smem>>
    %c3_i32_39 = arith.constant 3 : i32
    %160 = arith.addi %150, %c3_i32_39 : i32
    %161 = arith.index_cast %160 : i32 to index
    %162 = memref.load %arg2[%161] : memref<24xf32, #tpu.memory_space<smem>>
    %c4_i32_40 = arith.constant 4 : i32
    %163 = arith.addi %150, %c4_i32_40 : i32
    %164 = arith.index_cast %163 : i32 to index
    %165 = memref.load %arg2[%164] : memref<24xf32, #tpu.memory_space<smem>>
    %c5_i32_41 = arith.constant 5 : i32
    %166 = arith.addi %150, %c5_i32_41 : i32
    %167 = arith.index_cast %166 : i32 to index
    %168 = memref.load %arg2[%167] : memref<24xf32, #tpu.memory_space<smem>>
    %169 = vector.broadcast %153 : f32 to vector<1x256xf32>
    %170 = arith.mulf %169, %0 : vector<1x256xf32>
    %171 = vector.broadcast %156 : f32 to vector<1x256xf32>
    %172 = arith.mulf %171, %1 : vector<1x256xf32>
    %173 = arith.addf %170, %172 : vector<1x256xf32>
    %174 = vector.broadcast %159 : f32 to vector<1x256xf32>
    %175 = arith.addf %173, %174 : vector<1x256xf32>
    %cst_42 = arith.constant 1.000000e+00 : f32
    %176 = vector.broadcast %cst_42 : f32 to vector<1x256xf32>
    %177 = arith.addf %175, %176 : vector<1x256xf32>
    %cst_43 = arith.constant 7.500000e+00 : f32
    %178 = vector.broadcast %cst_43 : f32 to vector<1x256xf32>
    %179 = arith.mulf %177, %178 : vector<1x256xf32>
    %180 = vector.broadcast %162 : f32 to vector<1x256xf32>
    %181 = arith.mulf %180, %0 : vector<1x256xf32>
    %182 = vector.broadcast %165 : f32 to vector<1x256xf32>
    %183 = arith.mulf %182, %1 : vector<1x256xf32>
    %184 = arith.addf %181, %183 : vector<1x256xf32>
    %185 = vector.broadcast %168 : f32 to vector<1x256xf32>
    %186 = arith.addf %184, %185 : vector<1x256xf32>
    %cst_44 = arith.constant 1.000000e+00 : f32
    %187 = vector.broadcast %cst_44 : f32 to vector<1x256xf32>
    %188 = arith.addf %186, %187 : vector<1x256xf32>
    %cst_45 = arith.constant 7.500000e+00 : f32
    %189 = vector.broadcast %cst_45 : f32 to vector<1x256xf32>
    %190 = arith.mulf %188, %189 : vector<1x256xf32>
    %191 = math.floor %179 : vector<1x256xf32>
    %192 = arith.subf %179, %191 : vector<1x256xf32>
    %cst_46 = arith.constant 1.000000e+00 : f32
    %193 = vector.broadcast %cst_46 : f32 to vector<1x256xf32>
    %194 = arith.subf %193, %192 : vector<1x256xf32>
    %cst_47 = arith.constant 1.000000e+00 : f32
    %195 = vector.broadcast %cst_47 : f32 to vector<1x256xf32>
    %196 = arith.addf %191, %195 : vector<1x256xf32>
    %cst_48 = arith.constant 0.000000e+00 : f32
    %197 = vector.broadcast %cst_48 : f32 to vector<1x256xf32>
    %198 = arith.cmpf oge, %191, %197 : vector<1x256xf32>
    %cst_49 = arith.constant 1.500000e+01 : f32
    %199 = vector.broadcast %cst_49 : f32 to vector<1x256xf32>
    %200 = arith.cmpf ole, %191, %199 : vector<1x256xf32>
    %201 = arith.andi %198, %200 : vector<1x256xi1>
    %202 = arith.extui %201 : vector<1x256xi1> to vector<1x256xi32>
    %203 = arith.sitofp %202 : vector<1x256xi32> to vector<1x256xf32>
    %cst_50 = arith.constant 0.000000e+00 : f32
    %204 = vector.broadcast %cst_50 : f32 to vector<1x256xf32>
    %205 = arith.cmpf oge, %196, %204 : vector<1x256xf32>
    %cst_51 = arith.constant 1.500000e+01 : f32
    %206 = vector.broadcast %cst_51 : f32 to vector<1x256xf32>
    %207 = arith.cmpf ole, %196, %206 : vector<1x256xf32>
    %208 = arith.andi %205, %207 : vector<1x256xi1>
    %209 = arith.extui %208 : vector<1x256xi1> to vector<1x256xi32>
    %210 = arith.sitofp %209 : vector<1x256xi32> to vector<1x256xf32>
    %cst_52 = arith.constant -1.000000e+00 : f32
    %cst_53 = arith.constant 1.600000e+01 : f32
    %211 = vector.broadcast %cst_52 : f32 to vector<1x256xf32>
    %212 = arith.maximumf %211, %191 : vector<1x256xf32>
    %213 = vector.broadcast %cst_53 : f32 to vector<1x256xf32>
    %214 = arith.minimumf %213, %212 : vector<1x256xf32>
    %215 = arith.fptosi %214 : vector<1x256xf32> to vector<1x256xi32>
    %cst_54 = arith.constant -1.000000e+00 : f32
    %cst_55 = arith.constant 1.600000e+01 : f32
    %216 = vector.broadcast %cst_54 : f32 to vector<1x256xf32>
    %217 = arith.maximumf %216, %196 : vector<1x256xf32>
    %218 = vector.broadcast %cst_55 : f32 to vector<1x256xf32>
    %219 = arith.minimumf %218, %217 : vector<1x256xf32>
    %220 = arith.fptosi %219 : vector<1x256xf32> to vector<1x256xi32>
    %221 = vector.broadcast %215 : vector<1x256xi32> to vector<16x256xi32>
    %222 = arith.cmpi eq, %2, %221 : vector<16x256xi32>
    %223 = arith.extui %222 : vector<16x256xi1> to vector<16x256xi32>
    %224 = arith.sitofp %223 : vector<16x256xi32> to vector<16x256xf32>
    %225 = arith.mulf %194, %203 : vector<1x256xf32>
    %226 = vector.broadcast %225 : vector<1x256xf32> to vector<16x256xf32>
    %227 = arith.mulf %224, %226 : vector<16x256xf32>
    %228 = vector.broadcast %220 : vector<1x256xi32> to vector<16x256xi32>
    %229 = arith.cmpi eq, %2, %228 : vector<16x256xi32>
    %230 = arith.extui %229 : vector<16x256xi1> to vector<16x256xi32>
    %231 = arith.sitofp %230 : vector<16x256xi32> to vector<16x256xf32>
    %232 = arith.mulf %192, %210 : vector<1x256xf32>
    %233 = vector.broadcast %232 : vector<1x256xf32> to vector<16x256xf32>
    %234 = arith.mulf %231, %233 : vector<16x256xf32>
    %235 = arith.addf %227, %234 : vector<16x256xf32>
    %236 = math.floor %190 : vector<1x256xf32>
    %237 = arith.subf %190, %236 : vector<1x256xf32>
    %cst_56 = arith.constant 1.000000e+00 : f32
    %238 = vector.broadcast %cst_56 : f32 to vector<1x256xf32>
    %239 = arith.subf %238, %237 : vector<1x256xf32>
    %cst_57 = arith.constant 1.000000e+00 : f32
    %240 = vector.broadcast %cst_57 : f32 to vector<1x256xf32>
    %241 = arith.addf %236, %240 : vector<1x256xf32>
    %cst_58 = arith.constant 0.000000e+00 : f32
    %242 = vector.broadcast %cst_58 : f32 to vector<1x256xf32>
    %243 = arith.cmpf oge, %236, %242 : vector<1x256xf32>
    %cst_59 = arith.constant 1.500000e+01 : f32
    %244 = vector.broadcast %cst_59 : f32 to vector<1x256xf32>
    %245 = arith.cmpf ole, %236, %244 : vector<1x256xf32>
    %246 = arith.andi %243, %245 : vector<1x256xi1>
    %247 = arith.extui %246 : vector<1x256xi1> to vector<1x256xi32>
    %248 = arith.sitofp %247 : vector<1x256xi32> to vector<1x256xf32>
    %cst_60 = arith.constant 0.000000e+00 : f32
    %249 = vector.broadcast %cst_60 : f32 to vector<1x256xf32>
    %250 = arith.cmpf oge, %241, %249 : vector<1x256xf32>
    %cst_61 = arith.constant 1.500000e+01 : f32
    %251 = vector.broadcast %cst_61 : f32 to vector<1x256xf32>
    %252 = arith.cmpf ole, %241, %251 : vector<1x256xf32>
    %253 = arith.andi %250, %252 : vector<1x256xi1>
    %254 = arith.extui %253 : vector<1x256xi1> to vector<1x256xi32>
    %255 = arith.sitofp %254 : vector<1x256xi32> to vector<1x256xf32>
    %cst_62 = arith.constant -1.000000e+00 : f32
    %cst_63 = arith.constant 1.600000e+01 : f32
    %256 = vector.broadcast %cst_62 : f32 to vector<1x256xf32>
    %257 = arith.maximumf %256, %236 : vector<1x256xf32>
    %258 = vector.broadcast %cst_63 : f32 to vector<1x256xf32>
    %259 = arith.minimumf %258, %257 : vector<1x256xf32>
    %260 = arith.fptosi %259 : vector<1x256xf32> to vector<1x256xi32>
    %cst_64 = arith.constant -1.000000e+00 : f32
    %cst_65 = arith.constant 1.600000e+01 : f32
    %261 = vector.broadcast %cst_64 : f32 to vector<1x256xf32>
    %262 = arith.maximumf %261, %241 : vector<1x256xf32>
    %263 = vector.broadcast %cst_65 : f32 to vector<1x256xf32>
    %264 = arith.minimumf %263, %262 : vector<1x256xf32>
    %265 = arith.fptosi %264 : vector<1x256xf32> to vector<1x256xi32>
    %266 = vector.broadcast %260 : vector<1x256xi32> to vector<16x256xi32>
    %267 = arith.cmpi eq, %3, %266 : vector<16x256xi32>
    %268 = arith.extui %267 : vector<16x256xi1> to vector<16x256xi32>
    %269 = arith.sitofp %268 : vector<16x256xi32> to vector<16x256xf32>
    %270 = arith.mulf %239, %248 : vector<1x256xf32>
    %271 = vector.broadcast %270 : vector<1x256xf32> to vector<16x256xf32>
    %272 = arith.mulf %269, %271 : vector<16x256xf32>
    %273 = vector.broadcast %265 : vector<1x256xi32> to vector<16x256xi32>
    %274 = arith.cmpi eq, %3, %273 : vector<16x256xi32>
    %275 = arith.extui %274 : vector<16x256xi1> to vector<16x256xi32>
    %276 = arith.sitofp %275 : vector<16x256xi32> to vector<16x256xf32>
    %277 = arith.mulf %237, %255 : vector<1x256xf32>
    %278 = vector.broadcast %277 : vector<1x256xf32> to vector<16x256xf32>
    %279 = arith.mulf %276, %278 : vector<16x256xf32>
    %280 = arith.addf %272, %279 : vector<16x256xf32>
    %cst_66 = arith.constant dense<0.000000e+00> : vector<32x256xf32>
    %281 = tpu.matmul %4, %235, %cst_66 {dimension_numbers = #tpu.dot_dimension_numbers<[1], [0], [0], [1], [0, 0, 1, 1], [], []>} : vector<32x16xf32>, vector<16x256xf32>, vector<32x256xf32> -> vector<32x256xf32>
    %282 = vector.shape_cast %281 : vector<32x256xf32> to vector<2x16x256xf32>
    %283 = vector.shape_cast %280 : vector<16x256xf32> to vector<1x16x256xf32>
    %284 = vector.broadcast %283 : vector<1x16x256xf32> to vector<2x16x256xf32>
    %285 = arith.mulf %282, %284 : vector<2x16x256xf32>
    %cst_67 = arith.constant dense<0.000000e+00> : vector<2x256xf32>
    %286 = vector.multi_reduction <add>, %285, %cst_67 [1] : vector<2x16x256xf32> to vector<2x256xf32>
    %287 = arith.index_cast %c1_i32_33 : i32 to index
    %c0_68 = arith.constant 0 : index
    %c0_69 = arith.constant 0 : index
    %288 = vector.load %arg5[%287, %c0_68, %c0_69] : memref<2x2x256xf32, #tpu.memory_space<vmem>>, vector<1x2x256xf32>
    %289 = vector.shape_cast %288 : vector<1x2x256xf32> to vector<2x256xf32>
    %290 = vector.shape_cast %286 : vector<2x256xf32> to vector<1x2x256xf32>
    tpu.vector_store %arg5[%287, %c0_68, %c0_69], %290 {strides = array<i32>} : memref<2x2x256xf32, #tpu.memory_space<vmem>>, vector<1x2x256xf32>,
    %c2_i32_70 = arith.constant 2 : i32
    return
  }
  func.func @transform_0(%arg0: i32, %arg1: i32) -> i32 {
    %c0_i32 = arith.constant 0 : i32
    %c0_i32_0 = arith.constant 0 : i32
    return %c0_i32 : i32
  }
  func.func @transform_1(%arg0: i32, %arg1: i32) -> (i32, i32) {
    %c0_i32 = arith.constant 0 : i32
    %c0_i32_0 = arith.constant 0 : i32
    return %c0_i32, %arg1 : i32, i32
  }
  func.func @transform_2(%arg0: i32, %arg1: i32) -> (i32, i32) {
    %c0_i32 = arith.constant 0 : i32
    %c0_i32_0 = arith.constant 0 : i32
    %c0_i32_1 = arith.constant 0 : i32
    return %c0_i32, %c0_i32_0 : i32, i32
  }
  func.func @transform_3(%arg0: i32, %arg1: i32) -> (i32, i32, i32) {
    %c0_i32 = arith.constant 0 : i32
    %c0_i32_0 = arith.constant 0 : i32
    return %arg0, %c0_i32, %arg1 : i32, i32, i32
  }
}

</mosaic_0001>

<bundles_post_ra>
// kernel: tpu_custom_call.1
= control target key start
LH: loop header
LB: loop body
LE: loop exit
PB: predicated region body
PF: predicated region fallthrough
CT: control target
= control target key end

     0   :  { %8 = vsyncpa [#allocation4], 0  ;;  %s1688_s0 = inlined_call_operand.vmem [shape: f32[24], index: 0, kind: input, shape index: {}]   ;;  %s1689_s1 = inlined_call_operand.vmem [shape: f32[2,256], index: 1, kind: input, shape index: {}]   ;;  %s1690_s2 = inlined_call_operand.vmem [shape: f32[32,16], index: 2, kind: input, shape index: {}]   ;;  %s1691_s3 = inlined_call_operand.hbm [shape: f32[4,2,256], index: 3, kind: output, shape index: {}]  }
   0x1   :  { %9 = vsyncpa [#allocation3], 0 }
   0x2   :  { %11 = vsyncpa [#allocation3 + $0x1], 0  ;;  %s1366_s12 = smov 0   ;;  %s1368_s13 = smov 0  }
   0x3   :  { %s1370_s14 = smov 0   ;;  %s1372_s15 = smov 0  }
   0x4   :  { %s1374_s16 = smov 0   ;;  %s1376_s17 = smov 0  }
   0x5 LB: > { %s1090_s18 = sadd.s32 4294967295, %s1338_s17   ;;  %s1091_s19 = sadd.s32 4294967294, %s1338_s17   ;;  %s1338_s17 = sphi %s1376_s17, %s17_s17   ;;  %s1334_s16 = sphi %s1374_s16, %s1700_s16   ;;  %s1330_s15 = sphi %s1372_s15, %s1699_s15   ;;  %s1326_s14 = sphi %s1370_s14, %s1698_s14   ;;  %s1322_s13 = sphi %s1368_s13, %s1697_s13   ;;  %s1318_s12 = sphi %s1366_s12, %s1696_s12  }
   0x6   : > { %s29_s20 = sadd.s32 1, %s1334_s16  ;;  %s106_s21 = sadd.s32 1, %s1326_s14 }
   0x7   : > { %p31_p0 = scmp.ge.s32.totalorder %s29_s20, 2  ;;  %p116_p1 = scmp.ne.s32.totalorder %s1326_s14, %s1322_s13 }
   0x8   : > { %p117_p2 = scmp.eq.s32.totalorder %s1090_s18, 1  ;;  %p122_p3 = scmp.ne.s32.totalorder %s1322_s13, %s1318_s12 }
   0x9   : > { %s1702_s20 = smov (%p31_p0, %s29_s20), 0  ;;  %p123_p5 = scmp.eq.s32.totalorder %s1091_s19, 1 }
   0xa   : > { %p1406_p4 = por %p117_p2, %p116_p1  ;;  %s101_s23 = ssub.s32 %s1334_s16, %s1702_s20 }
   0xb   : > { %p1092_p6 = scmp.ge.s32.totalorder %s1338_s17, 1  ;;  %p104_p7 = scmp.eq.s32.totalorder %s101_s23, 0 }
   0xc   : > { %p1413_p8 = por %p123_p5, %p122_p3  ;;  %p130_p9 = scmp.lt.s32.totalorder %s1338_s17, 3 }
   0xd   : > { %s1419_s25 = scalar_select %p104_p7, %s1326_s14, %s106_s21  }
   0xe   : > { %p1421_p10 = pnand %p1092_p6, %p130_p9  ;;  %p1425_p11 = scmp.eq.s32.totalorder %s1090_s18, 0 }
   0xf   : > { %s143_s30 = sshll.u32 %s1688_s0, 4  ;;  %s144_s30 = int_to_ptr.vmem [resolvable:$true] %s143_s30 }
  0x10   : > { %p1179_p12 = pneg %p1421_p10  ;;  %s1243_s4 = scalar_lea.vmem %s144_s30, 16 }
  0x11   : > { %p1244_p0 = scmp.ne.s32.totalorder %s144_s30, %s1243_s4  ;;  %p1251_p5 = scmp.lt.s32.totalorder %s144_s30, %s144_s30 }
  0x12   : > { %p1180_p13 = pnand %p1425_p11, %p1179_p12  ;;  %p1252_p6 = scmp.lt.s32.totalorder %s1243_s4, %s1243_s4 }
  0x14   : > { %p1245_p1 = pneg %p1180_p13  ;;  %p1253_p7 = por %p1252_p6, %p1251_p5 }
  0x16   : > { %p1246_p2 = pnand %p1245_p1, %p1244_p0 }
  0x18   : > { %p1247_p3 = pneg %p1246_p2 }
  0x1a   : > { %p1254_p9 = pnand %p1253_p7, %p1247_p3 }
  0x1c   : > { %1257 = shalt.err (!%p1254_p9)
}
  0x1d   : > { %s1340_s5 = smov [#allocation2]   ;;  %168 = sbr.rel (%p1421_p10) target bundleno = 340 (0x154), region = 32 }
  0x1e   : > { %1182 = dma.vmem_to_smem (!%p1180_p13), %s144_s30, 16, %s1340_s5, [#allocation4]  }
  0x22   : > { %1309 = dma.done.wait (%p1425_p11), [#allocation4], 16  }
  0x23   : > { %1311 = vsyncadd (%p1425_p11), [#allocation4], 4294967280 }
  0x24   : > { %174 = sfence }
  0x25   : > { %s1443_s6 = smul.u32 12, %s1330_s15  ;;  %s1123_s7 = sshll.u32 %s1330_s15, 1  ;;  %v1341_v0 = vmov 0.0   ;;  %v1456_v1 = vld [vmem:[%s1689_s1] ss:$2 sm:$0x3]  ;;  %v204_v17 = vlaneseq }
  0x26   : > { %s607_s8 = sadd.s32 1, %s1123_s7  ;;  %510 = vmatprep.mubr.f32.mxu0 %v1341_v0  ;;  %894 = vmatprep.mubr.f32.mxu1 %v1341_v0  ;;  %v1463_v2 = vld [vmem:[%s1689_s1 + $0x1] ss:$2 sm:$0x3]  ;;  %s1156_s23 = sshll.u32 %s1330_s15, 7 }
  0x27   : > { %s212_s9 = sld [smem:[#allocation2 + %s1443_s6]]  ;;  %s213_s10 = sadd.s32 1, %s1443_s6  ;;  %v1470_v22 = vshrl.u32 %v204_v17, 7 }
  0x28   : > { %s214_s11 = sld [smem:[#allocation2 + %s213_s10]]  ;;  %s215_s18 = sadd.s32 2, %s1443_s6 }
  0x29   : > { %s216_s19 = sld [smem:[#allocation2 + %s215_s18]]  ;;  %s1451_s21 = smul.u32 6, %s607_s8  ;;  %v1475_v33 = vsub.s32 1, %v1470_v22  ;;  %v1478_v38 = vsub.s32 0, %v1470_v22  ;;  %v1481_v39 = vadd.s32 8, %v1470_v22 }
  0x2b   : > { %s609_s27 = sld [smem:[#allocation2 + %s1451_s21]]  ;;  %s610_s28 = sadd.s32 1, %s1451_s21 }
  0x2c   : > { %s611_s4 = sld [smem:[#allocation2 + %s610_s28]]  ;;  %s612_s5 = sadd.s32 2, %s1451_s21 }
  0x2d   : > { %v223_v3 = vstv %s212_s9  ;;  %s613_s7 = sld [smem:[#allocation2 + %s612_s5]]  ;;  %s219_s28 = sadd.s32 4, %s1443_s6 }
  0x2e   : > { %v224_v4 = vmul.f32 %v223_v3, %v1456_v1  ;;  %v225_v5 = vstv %s214_s11  ;;  %s220_s30 = sld [smem:[#allocation2 + %s219_s28]]  ;;  %s616_s8 = sadd.s32 4, %s1451_s21 }
  0x2f   : > { %v226_v6 = vmul.f32 %v1463_v2, %v225_v5  ;;  %v228_v7 = vstv %s216_s19  ;;  %s617_s10 = sld [smem:[#allocation2 + %s616_s8]]  ;;  %s618_s11 = sadd.s32 5, %s1451_s21 }
  0x30   : > { %s619_s18 = sld [smem:[#allocation2 + %s618_s11]] }
  0x31   : > { %v227_v8 = vadd.f32 %v226_v6, %v224_v4  ;;  %v620_v9 = vstv %s609_s27  ;;  %s217_s27 = sadd.s32 3, %s1443_s6 }
  0x32   : > { %v621_v10 = vmul.f32 %v620_v9, %v1456_v1  ;;  %v622_v11 = vstv %s611_s4  ;;  %s218_s29 = sld [smem:[#allocation2 + %s217_s27]]  ;;  %s221_s4 = sadd.s32 5, %s1443_s6 }
  0x33   : > { %v229_v12 = vadd.f32 %v228_v7, %v227_v8  ;;  %v623_v13 = vmul.f32 %v1463_v2, %v622_v11  ;;  %v625_v14 = vstv %s613_s7  ;;  %s222_s5 = sld [smem:[#allocation2 + %s221_s4]]  ;;  %s614_s7 = sadd.s32 3, %s1451_s21 }
  0x34   : > { %s615_s9 = sld [smem:[#allocation2 + %s614_s7]]  ;;  %s190_s6 = sand.u32 1, %s1322_s13  }
  0x35   : > { %v230_v15 = vadd.f32 1.0, %v229_v12  ;;  %v624_v16 = vadd.f32 %v623_v13, %v621_v10  ;;  %s1097_s21 = sshll.u32 %s190_s6, 3  ;;  %s1643_s15 = scalar_lea.sflag [#allocation3], %s190_s6 }
  0x36   : > { %s192_s19 = scalar_lea.vmem [#allocation5], %s1097_s21  ;;  %s1343_s4 = smov [#allocation5]  }
  0x37   : > { %v231_v18 = vmul.f32 7.5, %v230_v15  ;;  %v626_v19 = vadd.f32 %v625_v14, %v624_v16  ;;  %s1002_s26 = sshll.u32 %s192_s19, 4  ;;  %s1637_s26 = int_to_ptr.vmem [resolvable:$true] %s1002_s26 }
  0x39   : > { %v241_v20 = vfloor.f32 %v231_v18  ;;  %v627_v21 = vadd.f32 1.0, %v626_v19 }
  0x3b   : > { %v242_v23 = vsub.f32 %v231_v18, %v241_v20  ;;  %v244_v24 = vadd.f32 1.0, %v241_v20  ;;  %vm245_vm0 = vcmp.ge.f32.partialorder %v241_v20, 0.0  ;;  %vm246_vm1 = vcmp.le.f32.partialorder %v241_v20, 15.0 }
  0x3c   : > { %vm247_vm2 = vmand %vm245_vm0, %vm246_vm1  ;;  %v255_v25 = vmax.f32 %v241_v20, -1.0  ;;  %v628_v26 = vmul.f32 7.5, %v627_v21 }
  0x3d   : > { %v243_v27 = vsub.f32 1.0, %v242_v23  ;;  %v1099_v28 = vsel %vm247_vm2, 1.0, %v1341_v0  ;;  %vm250_vm3 = vcmp.ge.f32.partialorder %v244_v24, 0.0  ;;  %vm251_vm4 = vcmp.le.f32.partialorder %v244_v24, 15.0 }
  0x3e   : > { %vm252_vm5 = vmand %vm250_vm3, %vm251_vm4  ;;  %v256_v29 = vmin.f32 %v255_v25, 16.0  ;;  %v258_v30 = vmax.f32 %v244_v24, -1.0  ;;  %v638_v31 = vfloor.f32 %v628_v26  ;;  %vm433_vm4 = vcmask 130048  }
  0x3f   : > { %v1100_v32 = vsel %vm252_vm5, 1.0, %v1341_v0  ;;  %v281_v34 = vmul.f32 %v1099_v28, %v243_v27 }
  0x40   : > { %v1157_v35 = vtrunc.f32 %v256_v29  ;;  %v259_v36 = vmin.f32 %v258_v30, 16.0  ;;  %v317_v37 = vmul.f32 %v1100_v32, %v242_v23  ;;  %v639_v40 = vsub.f32 %v628_v26, %v638_v31 }
  0x41   : > { %v641_v41 = vadd.f32 1.0, %v638_v31  ;;  %vm642_vm6 = vcmp.ge.f32.partialorder %v638_v31, 0.0  ;;  %v290_v44 = vrot.slane %v281_v34, %v1475_v33  ;;  %v286_v45 = vrot.slane %v281_v34, %v1478_v38 }
  0x42   : > { %v1158_v42 = vcvt.f32.s32 %v1157_v35  ;;  %v1159_v43 = vtrunc.f32 %v259_v36  ;;  %v326_v46 = vrot.slane %v317_v37, %v1475_v33  ;;  %vm643_vm7 = vcmp.le.f32.partialorder %v638_v31, 15.0  ;;  %v207_v35 = vld [vmem:[%s1690_s2] sm:$0xff] }
  0x43   : > { %vm647_vm8 = vcmp.ge.f32.partialorder %v641_v41, 0.0  ;;  %vm648_vm9 = vcmp.le.f32.partialorder %v641_v41, 15.0  ;;  %v322_v50 = vrot.slane %v317_v37, %v1478_v38  ;;  %vm644_vm10 = vmand %vm642_vm6, %vm643_vm7  ;;  %v640_v51 = vsub.f32 1.0, %v639_v40 }
  0x44   : > { %v1160_v47 = vcvt.f32.s32 %v1159_v43  ;;  %v268_v48 = vrot.slane %v1158_v42, %v1475_v33  ;;  %v264_v49 = vrot.slane %v1158_v42, %v1478_v38  ;;  %v1124_v52 = vsel %vm644_vm10, 1.0, %v1341_v0  ;;  %vm649_vm11 = vmand %vm647_vm8, %vm648_vm9 }
  0x45   : > { %v652_v53 = vmax.f32 %v638_v31, -1.0  ;;  %v655_v54 = vmax.f32 %v641_v41, -1.0  ;;  %v1125_v59 = vsel %vm649_vm11, 1.0, %v1341_v0  ;;  %v678_v11 = vmul.f32 %v1124_v52, %v640_v51 }
  0x46   : > { %vm272_vm12 = vcmp.eq.s32.totalorder %v1481_v39, %v268_v48  ;;  %v304_v55 = vrot.slane %v1160_v47, %v1475_v33  ;;  %vm271_vm13 = vcmp.eq.s32.totalorder %v1481_v39, %v264_v49  ;;  %v300_v56 = vrot.slane %v1160_v47, %v1478_v38 }
  0x47   : > { %v1104_v57 = vsel %vm272_vm12, 1.0, %v1341_v0  ;;  %v1103_v58 = vsel %vm271_vm13, 1.0, %v1341_v0  ;;  %vm270_vm14 = vcmp.eq.s32.totalorder %v1470_v22, %v268_v48  ;;  %v653_v9 = vmin.f32 %v652_v53, 16.0 }
  0x48   : > { %v296_v60 = vmul.f32 %v1104_v57, %v290_v44  ;;  %vm308_vm15 = vcmp.eq.s32.totalorder %v1481_v39, %v304_v55  ;;  %v295_v61 = vmul.f32 %v1103_v58, %v286_v45  ;;  %vm307_vm0 = vcmp.eq.s32.totalorder %v1481_v39, %v300_v56  ;;  %v209_v58 = vld [vmem:[%s1690_s2 + $0x10] sm:$0xff] }
  0x49   : > { %v1108_v62 = vsel %vm308_vm15, 1.0, %v1341_v0  ;;  %v1107_v63 = vsel %vm307_vm0, 1.0, %v1341_v0  ;;  %v1102_v3 = vsel %vm270_vm14, 1.0, %v1341_v0  ;;  %vm306_vm1 = vcmp.eq.s32.totalorder %v1470_v22, %v304_v55 }
  0x4a   : > { %v332_v4 = vmul.f32 %v1108_v62, %v326_v46  ;;  %v331_v5 = vmul.f32 %v1107_v63, %v322_v50  ;;  %v294_v6 = vmul.f32 %v1102_v3, %v290_v44  ;;  %v1106_v7 = vsel %vm306_vm1, 1.0, %v1341_v0 }
  0x4b   : > { %v330_v8 = vmul.f32 %v1106_v7, %v326_v46  ;;  %v656_v10 = vmin.f32 %v655_v54, 16.0  ;;  %v714_v14 = vmul.f32 %v1125_v59, %v639_v40  ;;  %vm269_vm2 = vcmp.eq.s32.totalorder %v1470_v22, %v264_v49  ;;  %v208_v46 = vld [vmem:[%s1690_s2 + $0x8] sm:$0xff] }
  0x4c   : > { %v336_v12 = vadd.f32 %v332_v4, %v296_v60  ;;  %v335_v13 = vadd.f32 %v331_v5, %v295_v61  ;;  %v1165_v16 = vtrunc.f32 %v653_v9  ;;  %v687_v18 = vrot.slane %v678_v11, %v1475_v33  ;;  %v210_v60 = vld [vmem:[%s1690_s2 + $0x18] sm:$0xff] }
  0x4d   : > { %v334_v15 = vadd.f32 %v330_v8, %v294_v6  ;;  %v1167_v17 = vtrunc.f32 %v656_v10  ;;  %v1101_v19 = vsel %vm269_vm2, 1.0, %v1341_v0  ;;  %vm305_vm3 = vcmp.eq.s32.totalorder %v1470_v22, %v300_v56 }
  0x4e   : > { %474 = vmatprep.subr.mxu0 %v336_v12  ;;  %v1166_v20 = vcvt.f32.s32 %v1165_v16  ;;  %v293_v23 = vmul.f32 %v1101_v19, %v286_v45  ;;  %v1105_v24 = vsel %vm305_vm3, 1.0, %v1341_v0  ;;  %v723_v25 = vrot.slane %v714_v14, %v1475_v33 }
  0x4f   : > { %475 = vmatpush1.msra.mxu0 %v335_v13  ;;  %v1168_v21 = vcvt.f32.s32 %v1167_v17  ;;  %v329_v26 = vmul.f32 %v1105_v24, %v322_v50  ;;  %v683_v27 = vrot.slane %v678_v11, %v1478_v38  ;;  %v719_v28 = vrot.slane %v714_v14, %v1478_v38 }
  0x50   : > { %476 = vmatprep.subr.mxu0 %v334_v15  ;;  %v665_v29 = vrot.slane %v1166_v20, %v1475_v33  ;;  %v661_v31 = vrot.slane %v1166_v20, %v1478_v38  ;;  %v232_v61 = vstv %s218_s29  ;;  %v234_v62 = vstv %s220_s30  ;;  %s1635_s29 = scalar_lea.hbm %s1691_s3, %s1156_s23  ;;  %s1258_s30 = scalar_lea.vmem %s1637_s26, 128 }
  0x51   : > { %v701_v30 = vrot.slane %v1168_v21, %v1475_v33  ;;  %v697_v32 = vrot.slane %v1168_v21, %v1478_v38  ;;  %v333_v34 = vadd.f32 %v329_v26, %v293_v23  ;;  %v233_v63 = vmul.f32 %v232_v61, %v1456_v1  ;;  %p1259_p10 = scmp.ne.s32.totalorder %s1637_s26, %s1258_s30 }
  0x52   : > { %vm669_vm5 = vcmp.eq.s32.totalorder %v1481_v39, %v665_v29  ;;  %vm668_vm7 = vcmp.eq.s32.totalorder %v1481_v39, %v661_v31  ;;  %vm667_vm9 = vcmp.eq.s32.totalorder %v1470_v22, %v665_v29  ;;  %vm666_vm11 = vcmp.eq.s32.totalorder %v1470_v22, %v661_v31 }
  0x53   : > { %vm705_vm6 = vcmp.eq.s32.totalorder %v1481_v39, %v701_v30  ;;  %vm704_vm8 = vcmp.eq.s32.totalorder %v1481_v39, %v697_v32  ;;  %v1129_v36 = vsel %vm669_vm5, 1.0, %v1341_v0  ;;  %477 = vmatpush1.msra.mxu0 %v333_v34  ;;  %v1128_v40 = vsel %vm668_vm7, 1.0, %v1341_v0  ;;  %p1260_p11 = pnand %p1259_p10, %p1406_p4 }
  0x54   : > { %v1133_v37 = vsel %vm705_vm6, 1.0, %v1341_v0  ;;  %v1132_v41 = vsel %vm704_vm8, 1.0, %v1341_v0  ;;  %v693_v42 = vmul.f32 %v1129_v36, %v687_v18  ;;  %v692_v44 = vmul.f32 %v1128_v40, %v683_v27  ;;  %1119 = vmatmul.mubr.msk.f32.vlgmr.msra.gmra.mxu0 %vm433_vm4, %v207_v35 }
  0x55   : > { %v729_v43 = vmul.f32 %v1133_v37, %v723_v25  ;;  %v728_v45 = vmul.f32 %v1132_v41, %v719_v28  ;;  %vm703_vm10 = vcmp.eq.s32.totalorder %v1470_v22, %v701_v30  ;;  %vm702_vm12 = vcmp.eq.s32.totalorder %v1470_v22, %v697_v32  ;;  %516 = vmatprep.mubr.f32.mxu0 %v1341_v0  ;;  %p1261_p12 = pneg %p1260_p11 }
  0x56   : > { %v1127_v49 = vsel %vm667_vm9, 1.0, %v1341_v0  ;;  %v1131_v50 = vsel %vm703_vm10, 1.0, %v1341_v0  ;;  %v1126_v53 = vsel %vm666_vm11, 1.0, %v1341_v0  ;;  %v1130_v54 = vsel %vm702_vm12, 1.0, %v1341_v0 }
  0x57   : > { %v733_v47 = vadd.f32 %v729_v43, %v693_v42  ;;  %v732_v48 = vadd.f32 %v728_v45, %v692_v44  ;;  %v691_v51 = vmul.f32 %v1127_v49, %v687_v18  ;;  %v727_v52 = vmul.f32 %v1131_v50, %v723_v25 }
  0x58   : > { %v690_v55 = vmul.f32 %v1126_v53, %v683_v27  ;;  %v726_v56 = vmul.f32 %v1130_v54, %v719_v28  ;;  %1120 = vmatmul.mubr.msk.f32.gmra.mxu0 %vm433_vm4, %v208_v46  ;;  %v235_v3 = vmul.f32 %v1463_v2, %v234_v62  ;;  %v237_v5 = vstv %s222_s5  ;;  %s1262_s5 = sshll.u32 %s1343_s4, 4  ;;  %s1263_s5 = int_to_ptr.vmem [resolvable:$false] %s1262_s5 }
  0x59   : > { %858 = vmatprep.subr.mxu1 %v733_v47  ;;  %v731_v57 = vadd.f32 %v727_v52, %v691_v51  ;;  %522 = vmatprep.mubr.f32.mxu0 %v1341_v0  ;;  %v629_v7 = vstv %s615_s9  ;;  %v631_v8 = vstv %s617_s10  ;;  %v634_v14 = vstv %s619_s18  ;;  %s1264_s7 = scalar_lea.vmem %s1263_s5, 256  ;;  %p1265_p13 = scmp.lt.s32.totalorder %s1637_s26, %s1263_s5 }
  0x5a   : > { %859 = vmatpush1.msra.mxu1 %v732_v48  ;;  %v730_v59 = vadd.f32 %v726_v56, %v690_v55  ;;  %v236_v4 = vadd.f32 %v235_v3, %v233_v63  ;;  %v630_v10 = vmul.f32 %v629_v7, %v1456_v1  ;;  %v632_v11 = vmul.f32 %v1463_v2, %v631_v8  ;;  %p1266_p0 = scmp.lt.s32.totalorder %s1264_s7, %s1258_s30 }
  0x5b   : > { %860 = vmatprep.subr.mxu1 %v731_v57 }
  0x5c   : > { %861 = vmatpush1.msra.mxu1 %v730_v59  ;;  %1121 = vmatmul.mubr.msk.f32.gmra.mxu0 %vm433_vm4, %v209_v58  ;;  %v238_v6 = vadd.f32 %v237_v5, %v236_v4  ;;  %v633_v13 = vadd.f32 %v632_v11, %v630_v10  ;;  %p1267_p1 = por %p1266_p0, %p1265_p13 }
  0x5d   : > { %1144 = vmatmul.mubr.msk.f32.vlgmr.msra.gmra.mxu1 %vm433_vm4, %v207_v35  ;;  %528 = vmatprep.mubr.f32.mxu0 %v1341_v0 }
  0x5e   : > { %900 = vmatprep.mubr.f32.mxu1 %v1341_v0  ;;  %v239_v9 = vadd.f32 1.0, %v238_v6  ;;  %v635_v16 = vadd.f32 %v634_v14, %v633_v13  ;;  %p1268_p2 = pnand %p1267_p1, %p1261_p12 }
  0x60   : > { %1122 = vmatmul.mubr.msk.f32.gmra.mxu0 %vm433_vm4, %v210_v60  ;;  %v240_v12 = vmul.f32 7.5, %v239_v9  ;;  %v636_v18 = vadd.f32 1.0, %v635_v16 }
  0x61   : > { %1145 = vmatmul.mubr.msk.f32.gmra.mxu1 %vm433_vm4, %v208_v46 }
  0x62   : > { %906 = vmatprep.mubr.f32.mxu1 %v1341_v0  ;;  %v337_v15 = vfloor.f32 %v240_v12  ;;  %v637_v21 = vmul.f32 7.5, %v636_v18 }
  0x64   : > { %v340_v17 = vadd.f32 1.0, %v337_v15  ;;  %v351_v19 = vmax.f32 %v337_v15, -1.0  ;;  %v734_v25 = vfloor.f32 %v637_v21  ;;  %vm341_vm13 = vcmp.ge.f32.partialorder %v337_v15, 0.0 }
  0x65   : > { %1146 = vmatmul.mubr.msk.f32.gmra.mxu1 %vm433_vm4, %v209_v58  ;;  %vm342_vm14 = vcmp.le.f32.partialorder %v337_v15, 15.0  ;;  %v338_v28 = vsub.f32 %v240_v12, %v337_v15 }
  0x66   : > { %912 = vmatprep.mubr.f32.mxu1 %v1341_v0  ;;  %v354_v20 = vmax.f32 %v340_v17, -1.0  ;;  %v352_v23 = vmin.f32 %v351_v19, 16.0  ;;  %vm346_vm15 = vcmp.ge.f32.partialorder %v340_v17, 0.0  ;;  %vm347_vm0 = vcmp.le.f32.partialorder %v340_v17, 15.0  ;;  %vm343_vm1 = vmand %vm341_vm13, %vm342_vm14 }
  0x67   : > { %v737_v1 = vadd.f32 1.0, %v734_v25  ;;  %v748_v2 = vmax.f32 %v734_v25, -1.0  ;;  %vm348_vm2 = vmand %vm346_vm15, %vm347_vm0  ;;  %v339_v34 = vsub.f32 1.0, %v338_v28  ;;  %v1109_v35 = vsel %vm343_vm1, 1.0, %v1341_v0 }
  0x68   : > { %v355_v24 = vmin.f32 %v354_v20, 16.0  ;;  %v1161_v26 = vtrunc.f32 %v352_v23  ;;  %v1110_v36 = vsel %vm348_vm2, 1.0, %v1341_v0  ;;  %vm738_vm3 = vcmp.ge.f32.partialorder %v734_v25, 0.0 }
  0x69   : > { %1147 = vmatmul.mubr.msk.f32.gmra.mxu1 %vm433_vm4, %v210_v60  ;;  %v749_v31 = vmin.f32 %v748_v2, 16.0  ;;  %v751_v32 = vmax.f32 %v737_v1, -1.0  ;;  %v377_v43 = vmul.f32 %v1109_v35, %v339_v34  ;;  %v413_v44 = vmul.f32 %v1110_v36, %v338_v28 }
  0x6a   : > { %v1163_v27 = vtrunc.f32 %v355_v24  ;;  %v1162_v29 = vcvt.f32.s32 %v1161_v26  ;;  %vm739_vm4 = vcmp.le.f32.partialorder %v734_v25, 15.0  ;;  %v735_v45 = vsub.f32 %v637_v21, %v734_v25 }
  0x6b   : > { %v1169_v41 = vtrunc.f32 %v749_v31  ;;  %v752_v42 = vmin.f32 %v751_v32, 16.0  ;;  %vm740_vm7 = vmand %vm738_vm3, %vm739_vm4  ;;  %v382_v50 = vrot.slane %v377_v43, %v1478_v38  ;;  %v418_v51 = vrot.slane %v413_v44, %v1478_v38 }
  0x6c   : > { %v1164_v30 = vcvt.f32.s32 %v1163_v27  ;;  %v360_v37 = vrot.slane %v1162_v29, %v1478_v38  ;;  %v364_v46 = vrot.slane %v1162_v29, %v1475_v33  ;;  %vm743_vm8 = vcmp.ge.f32.partialorder %v737_v1, 0.0 }
  0x6d   : > { %v1170_v48 = vcvt.f32.s32 %v1169_v41  ;;  %v1171_v49 = vtrunc.f32 %v752_v42  ;;  %vm744_vm9 = vcmp.le.f32.partialorder %v737_v1, 15.0  ;;  %v736_v54 = vsub.f32 1.0, %v735_v45 }
  0x6e   : > { %v396_v40 = vrot.slane %v1164_v30, %v1478_v38  ;;  %vm365_vm5 = vcmp.eq.s32.totalorder %v1470_v22, %v360_v37  ;;  %v400_v47 = vrot.slane %v1164_v30, %v1475_v33  ;;  %v1134_v55 = vsel %vm740_vm7, 1.0, %v1341_v0  ;;  %vm745_vm14 = vmand %vm743_vm8, %vm744_vm9 }
  0x6f   : > { %v1111_v52 = vsel %vm365_vm5, 1.0, %v1341_v0  ;;  %vm367_vm10 = vcmp.eq.s32.totalorder %v1481_v39, %v360_v37  ;;  %vm366_vm12 = vcmp.eq.s32.totalorder %v1470_v22, %v364_v46  ;;  %v1172_v56 = vcvt.f32.s32 %v1171_v49 }
  0x70   : > { %vm401_vm6 = vcmp.eq.s32.totalorder %v1470_v22, %v396_v40  ;;  %vm403_vm11 = vcmp.eq.s32.totalorder %v1481_v39, %v396_v40  ;;  %vm402_vm13 = vcmp.eq.s32.totalorder %v1470_v22, %v400_v47  ;;  %v757_v57 = vrot.slane %v1170_v48, %v1478_v38 }
  0x71   : > { %v1115_v53 = vsel %vm401_vm6, 1.0, %v1341_v0  ;;  %v389_v58 = vmul.f32 %v1111_v52, %v382_v50  ;;  %vm368_vm15 = vcmp.eq.s32.totalorder %v1481_v39, %v364_v46  ;;  %vm404_vm0 = vcmp.eq.s32.totalorder %v1481_v39, %v400_v47 }
  0x72   : > { %v425_v59 = vmul.f32 %v1115_v53, %v418_v51  ;;  %v386_v60 = vrot.slane %v377_v43, %v1475_v33  ;;  %v422_v61 = vrot.slane %v413_v44, %v1475_v33  ;;  %v1113_v62 = vsel %vm367_vm10, 1.0, %v1341_v0 }
  0x73   : > { %v1117_v63 = vsel %vm403_vm11, 1.0, %v1341_v0  ;;  %v1112_v3 = vsel %vm366_vm12, 1.0, %v1341_v0  ;;  %v1116_v4 = vsel %vm402_vm13, 1.0, %v1341_v0  ;;  %v1135_v5 = vsel %vm745_vm14, 1.0, %v1341_v0 }
  0x74   : > { %v774_v6 = vmul.f32 %v1134_v55, %v736_v54  ;;  %vm762_vm1 = vcmp.eq.s32.totalorder %v1470_v22, %v757_v57  ;;  %v793_v7 = vrot.slane %v1172_v56, %v1478_v38  ;;  %v1114_v8 = vsel %vm368_vm15, 1.0, %v1341_v0 }
  0x75   : > { %v1118_v9 = vsel %vm404_vm0, 1.0, %v1341_v0  ;;  %v391_v10 = vmul.f32 %v1113_v62, %v382_v50  ;;  %v427_v11 = vmul.f32 %v1117_v63, %v418_v51  ;;  %v761_v12 = vrot.slane %v1170_v48, %v1475_v33 }
  0x76   : > { %v797_v13 = vrot.slane %v1172_v56, %v1475_v33  ;;  %v390_v14 = vmul.f32 %v1112_v3, %v386_v60  ;;  %v426_v15 = vmul.f32 %v1116_v4, %v422_v61  ;;  %v810_v16 = vmul.f32 %v1135_v5, %v735_v45 }
  0x77   : > { %v429_v17 = vadd.f32 %v425_v59, %v389_v58  ;;  %v392_v18 = vmul.f32 %v1114_v8, %v386_v60  ;;  %v428_v19 = vmul.f32 %v1118_v9, %v422_v61  ;;  %v1136_v21 = vsel %vm762_vm1, 1.0, %v1341_v0 }
  0x78   : > { %vm798_vm2 = vcmp.eq.s32.totalorder %v1470_v22, %v793_v7  ;;  %vm764_vm3 = vcmp.eq.s32.totalorder %v1481_v39, %v757_v57  ;;  %vm800_vm4 = vcmp.eq.s32.totalorder %v1481_v39, %v793_v7  ;;  %v779_v23 = vrot.slane %v774_v6, %v1478_v38 }
  0x79   : > { %v431_v24 = vadd.f32 %v427_v11, %v391_v10  ;;  %vm763_vm5 = vcmp.eq.s32.totalorder %v1470_v22, %v761_v12  ;;  %vm799_vm6 = vcmp.eq.s32.totalorder %v1470_v22, %v797_v13  ;;  %v430_v25 = vadd.f32 %v426_v15, %v390_v14 }
  0x7a   : > { %v815_v27 = vrot.slane %v810_v16, %v1478_v38  ;;  %vm765_vm7 = vcmp.eq.s32.totalorder %v1481_v39, %v761_v12  ;;  %vm801_vm8 = vcmp.eq.s32.totalorder %v1481_v39, %v797_v13  ;;  %v1140_v1 = vsel %vm798_vm2, 1.0, %v1341_v0 }
  0x7b   : > { %v432_v2 = vadd.f32 %v428_v19, %v392_v18  ;;  %v1138_v28 = vsel %vm764_vm3, 1.0, %v1341_v0  ;;  %v1142_v29 = vsel %vm800_vm4, 1.0, %v1341_v0  ;;  %v1137_v31 = vsel %vm763_vm5, 1.0, %v1341_v0 }
  0x7c   : > { %v783_v32 = vrot.slane %v774_v6, %v1475_v33  ;;  %v1141_v34 = vsel %vm799_vm6, 1.0, %v1341_v0  ;;  %v819_v38 = vrot.slane %v810_v16, %v1475_v33  ;;  %v1139_v39 = vsel %vm765_vm7, 1.0, %v1341_v0 }
  0x7d   : > { %v1143_v37 = vsel %vm801_vm8, 1.0, %v1341_v0  ;;  %v786_v40 = vmul.f32 %v1136_v21, %v779_v23  ;;  %v822_v41 = vmul.f32 %v1140_v1, %v815_v27  ;;  %v788_v43 = vmul.f32 %v1138_v28, %v779_v23 }
  0x7e   : > { %v824_v44 = vmul.f32 %v1142_v29, %v815_v27  ;;  %v787_v48 = vmul.f32 %v1137_v31, %v783_v32  ;;  %v823_v49 = vmul.f32 %v1141_v34, %v819_v38  ;;  %v789_v51 = vmul.f32 %v1139_v39, %v783_v32 }
  0x7f   : > { %v825_v52 = vmul.f32 %v1143_v37, %v819_v38  ;;  %v826_v55 = vadd.f32 %v822_v41, %v786_v40  ;;  %vm596_vm9 = vcmask 1041409   ;;  %vm598_vm10 = vcmask 1043459  }
  0x80   : > { %v828_v56 = vadd.f32 %v824_v44, %v788_v43  ;;  %v827_v59 = vadd.f32 %v823_v49, %v787_v48  ;;  %vm600_vm11 = vcmask 1045509   ;;  %vm602_vm12 = vcmask 1047559  }
  0x81   : > { %v829_v60 = vadd.f32 %v825_v52, %v789_v51 }
 0x114   : > { %v512_v20 = vpop.f32.mrf.mxu0 }
 0x115   : > { %v535_v35 = vmul.f32 %v512_v20, %v429_v17 }
 0x116   : > { %v514_v26 = vpop.f32.mrf.mxu0 }
 0x117   : > { %v536_v45 = vmul.f32 %v514_v26, %v430_v25 }
 0x118   : > { %v518_v30 = vpop.f32.mrf.mxu0 }
 0x119   : > { %v537_v36 = vmul.f32 %v518_v30, %v431_v24 }
 0x11a   : > { %v520_v42 = vpop.f32.mrf.mxu0 }
 0x11b   : > { %v543_v46 = vadd.f32 %v537_v36, %v535_v35  ;;  %v538_v47 = vmul.f32 %v520_v42, %v432_v2  ;;  %v1342_v36 = vmov 1983009808  }
 0x11c   : > { %v524_v50 = vpop.f32.mrf.mxu0  ;;  %v577_v39 = vunpack.c.l.s4 %v1342_v36 }
 0x11d   : > { %v896_v33 = vpop.f32.mrf.mxu1  ;;  %v544_v53 = vrot.slane %v543_v46, 4  ;;  %v550_v54 = vadd.f32 %v538_v47, %v536_v45  ;;  %v539_v4 = vmul.f32 %v524_v50, %v429_v17 }
 0x11e   : > { %v526_v57 = vpop.f32.mrf.mxu0  ;;  %v919_v6 = vmul.f32 %v896_v33, %v826_v55  ;;  %v578_v33 = vunpack.c.0.s8 %v577_v39 }
 0x11f   : > { %v898_v0 = vpop.f32.mrf.mxu1  ;;  %v551_v58 = vrot.slane %v550_v54, 4  ;;  %v545_v62 = vadd.f32 %v544_v53, %v543_v46  ;;  %v540_v11 = vmul.f32 %v526_v57, %v430_v25 }
 0x120   : > { %v530_v61 = vpop.f32.mrf.mxu0  ;;  %v920_v14 = vmul.f32 %v898_v0, %v827_v59 }
 0x121   : > { %v552_v63 = vadd.f32 %v551_v58, %v550_v54  ;;  %v902_v3 = vpop.f32.mrf.mxu1  ;;  %v541_v5 = vmul.f32 %v530_v61, %v431_v24  ;;  %v546_v18 = vrot.slane %v545_v62, 2 }
 0x122   : > { %v921_v7 = vmul.f32 %v902_v3, %v828_v56  ;;  %v532_v8 = vpop.f32.mrf.mxu0 }
 0x123   : > { %v553_v9 = vrot.slane %v552_v63, 2  ;;  %v904_v10 = vpop.f32.mrf.mxu1  ;;  %v557_v12 = vadd.f32 %v541_v5, %v539_v4  ;;  %v542_v13 = vmul.f32 %v532_v8, %v432_v2  ;;  %v547_v29 = vadd.f32 %v546_v18, %v545_v62 }
 0x124   : > { %v927_v15 = vadd.f32 %v921_v7, %v919_v6  ;;  %v922_v16 = vmul.f32 %v904_v10, %v829_v60 }
 0x125   : > { %v908_v19 = vpop.f32.mrf.mxu1  ;;  %v558_v20 = vrot.slane %v557_v12, 4  ;;  %v564_v21 = vadd.f32 %v542_v13, %v540_v11  ;;  %v554_v27 = vadd.f32 %v553_v9, %v552_v63  ;;  %v548_v46 = vrot.slane %v547_v29, 1 }
 0x126   : > { %v928_v23 = vrot.slane %v927_v15, 4  ;;  %v934_v26 = vadd.f32 %v922_v16, %v920_v14  ;;  %v923_v34 = vmul.f32 %v908_v19, %v826_v55  ;;  %v581_v63 = vsub.s32 %v578_v33, %v1470_v22 }
 0x127   : > { %v559_v17 = vadd.f32 %v558_v20, %v557_v12  ;;  %v910_v24 = vpop.f32.mrf.mxu1  ;;  %v565_v1 = vrot.slane %v564_v21, 4  ;;  %v555_v35 = vrot.slane %v554_v27, 1  ;;  %v549_v57 = vadd.f32 %v548_v46, %v547_v29 }
 0x128   : > { %v935_v28 = vrot.slane %v934_v26, 4  ;;  %v929_v32 = vadd.f32 %v928_v23, %v927_v15  ;;  %v924_v43 = vmul.f32 %v910_v24, %v827_v59 }
 0x129   : > { %v560_v30 = vrot.slane %v559_v17, 2  ;;  %v566_v31 = vadd.f32 %v565_v1, %v564_v21  ;;  %v914_v25 = vpop.f32.mrf.mxu1  ;;  %v556_v52 = vadd.f32 %v555_v35, %v554_v27 }
 0x12a   : > { %v936_v2 = vadd.f32 %v935_v28, %v934_v26  ;;  %v925_v38 = vmul.f32 %v914_v25, %v828_v56  ;;  %v930_v49 = vrot.slane %v929_v32, 2 }
 0x12b   : > { %v561_v37 = vadd.f32 %v560_v30, %v559_v17  ;;  %v567_v40 = vrot.slane %v566_v31, 2  ;;  %v916_v41 = vpop.f32.mrf.mxu1  ;;  %v575_v62 = vcombine.low %v549_v57, %v556_v52 }
 0x12c   : > { %v937_v42 = vrot.slane %v936_v2, 2  ;;  %v941_v44 = vadd.f32 %v925_v38, %v923_v34  ;;  %v926_v45 = vmul.f32 %v916_v41, %v829_v60  ;;  %v931_v61 = vadd.f32 %v930_v49, %v929_v32 }
 0x12d   : > { %v562_v47 = vrot.slane %v561_v37, 1  ;;  %v568_v48 = vadd.f32 %v567_v40, %v566_v31  ;;  %v582_v11 = vrot.slane %v575_v62, %v581_v63 }
 0x12e   : > { %v942_v50 = vrot.slane %v941_v44, 4  ;;  %v948_v51 = vadd.f32 %v926_v45, %v924_v43  ;;  %v938_v54 = vadd.f32 %v937_v42, %v936_v2  ;;  %v932_v8 = vrot.slane %v931_v61, 1 }
 0x12f   : > { %v569_v53 = vrot.slane %v568_v48, 1  ;;  %v563_v0 = vadd.f32 %v562_v47, %v561_v37 }
 0x130   : > { %v943_v55 = vadd.f32 %v942_v50, %v941_v44  ;;  %v949_v56 = vrot.slane %v948_v51, 4  ;;  %v939_v4 = vrot.slane %v938_v54, 1  ;;  %v933_v15 = vadd.f32 %v932_v8, %v931_v61 }
 0x131   : > { %v570_v58 = vadd.f32 %v569_v53, %v568_v48 }
 0x132   : > { %v944_v59 = vrot.slane %v943_v55, 2  ;;  %v950_v60 = vadd.f32 %v949_v56, %v948_v51  ;;  %v940_v13 = vadd.f32 %v939_v4, %v938_v54 }
 0x133   : > { %v583_v3 = vcombine.low %v563_v0, %v570_v58 }
 0x134   : > { %v945_v5 = vadd.f32 %v944_v59, %v943_v55  ;;  %v951_v6 = vrot.slane %v950_v60, 2  ;;  %v959_v21 = vcombine.low %v933_v15, %v940_v13 }
 0x135   : > { %v590_v7 = vrot.slane %v583_v3, %v581_v63 }
 0x136   : > { %v946_v9 = vrot.slane %v945_v5, 1  ;;  %v952_v10 = vadd.f32 %v951_v6, %v950_v60  ;;  %v966_v17 = vrot.slane %v959_v21, %v581_v63 }
 0x137   : > { %v595_v12 = vrot.slane %v590_v7, 7 }
 0x138   : > { %v953_v14 = vrot.slane %v952_v10, 1  ;;  %v947_v16 = vadd.f32 %v946_v9, %v945_v5 }
 0x139   : > { %v597_v22 = vsel %vm596_vm9, %v595_v12, %v582_v11 }
 0x13a   : > { %v954_v18 = vadd.f32 %v953_v14, %v952_v10  ;;  %v599_v19 = vsel %vm598_vm10, %v595_v12, %v597_v22 }
 0x13b   : > { %v601_v20 = vsel %vm600_vm11, %v595_v12, %v599_v19 }
 0x13c   : > { %v967_v23 = vcombine.low %v947_v16, %v954_v18  ;;  %v603_v26 = vsel %vm602_vm12, %v595_v12, %v601_v20 }
 0x13d   : > { %605 = vst [vmem:[%s192_s19] sm:$0xf] %v603_v26 }
 0x13e   : > { %v974_v27 = vrot.slane %v967_v23, %v581_v63 }
 0x140   : > { %v977_v24 = vrot.slane %v974_v27, 7 }
 0x142   : > { %v978_v1 = vsel %vm596_vm9, %v977_v24, %v966_v17 }
 0x143   : > { %v979_v28 = vsel %vm598_vm10, %v977_v24, %v978_v1 }
 0x144   : > { %v980_v29 = vsel %vm600_vm11, %v977_v24, %v979_v28 }
 0x145   : > { %v981_v30 = vsel %vm602_vm12, %v977_v24, %v980_v29 }
 0x146   : > { %1148 = vst [vmem:[%s192_s19 + $0x4] sm:$0xf] %v981_v30 }
 0x147   : > { %1271 = shalt.err (!%p1268_p2)
}
 0x148   : > { %s1272_s8 = scalar_lea.hbm %s1635_s29, 128  ;;  %s1276_s11 = scalar_lea.hbm %s1691_s3, 256 }
 0x149   : > { %p1273_p3 = scmp.ne.s32.totalorder %s1635_s29, %s1272_s8  ;;  %p1277_p7 = scmp.lt.s32.totalorder %s1635_s29, %s1691_s3 }
 0x14a   : > { %p1278_p9 = scmp.lt.s32.totalorder %s1276_s11, %s1272_s8 }
 0x14b   : > { %p1274_p5 = pnand %p1273_p3, %p1406_p4 }
 0x14c   : > { %p1279_p10 = por %p1278_p9, %p1277_p7 }
 0x14d   : > { %p1275_p6 = pneg %p1274_p5 }
 0x14f   : > { %p1280_p11 = pnand %p1279_p10, %p1275_p6 }
 0x151   : > { %1283 = shalt.err (!%p1280_p11)
}
 0x152   : > { %s1344_s21 = smov 64   ;;  %s1345_s19 = smov 4  }
 0x153   : > { %1177 = dma.vmem_to_hbm [thread:$0]  (%p1406_p4), %s1637_s26, 128, %s1635_s29, %s1643_s15, %s1344_s21, %s1344_s21, %s1345_s19  }
 0x154 PF: > { %p1189_p12 = scmp.ge.s32.totalorder %s1338_s17, 2  ;;  %s1017_s23 = sand.u32 1, %s1318_s12  }
 0x155   : > { %s1018_s27 = scalar_lea.sflag [#allocation3], %s1017_s23 }
 0x156   : > { %p1184_p13 = pnand %p1189_p12, %p1413_p8 }
 0x158   : > { %p1185_p0 = pneg %p1184_p13 }
 0x15a   : > { %1313 = dma.done.wait (%p1185_p0), %s1018_s27, 128  }
 0x15b   : > { %1315 = vsyncadd (%p1185_p0), %s1018_s27, 4294967168  ;;  %s17_s17 = sadd.s32 1, %s1338_s17   ;;  %s1696_s12 = smov %s1322_s13 }
 0x15c   : > { %p14_p1 = scmp.ge.s32.totalorder %s17_s17, 4   ;;  %s1697_s13 = smov %s1326_s14 }
 0x15d   : > { %s1698_s14 = smov %s1419_s25  ;;  %s1699_s15 = smov %s1334_s16 }
 0x15e   : > { %s1700_s16 = smov %s1702_s20  ;;  %16 = sbr.rel (!%p14_p1) target bundleno = 5 (0x5), region = 74 }
 0x163   :  { %1023 = vsyncpa [#allocation3], 1 }
 0x164   :  { %1025 = vsyncpa [#allocation3 + $0x1], 1 }
 0x165   :  { %1026 = vsyncpa [#allocation4], 1 }
 0x166   :  { %1028 = vsyncpa [#allocation4 + $0x1], 1 }

// kernel: tpu_custom_call.1
= control target key start
LH: loop header
LB: loop body
LE: loop exit
PB: predicated region body
PF: predicated region fallthrough
CT: control target
= control target key end

     0   :  { %8 = vsyncpa [#allocation4], 0  ;;  %s1688_s0 = inlined_call_operand.vmem [shape: f32[24], index: 0, kind: input, shape index: {}]   ;;  %s1689_s1 = inlined_call_operand.vmem [shape: f32[2,256], index: 1, kind: input, shape index: {}]   ;;  %s1690_s2 = inlined_call_operand.vmem [shape: f32[32,16], index: 2, kind: input, shape index: {}]   ;;  %s1691_s3 = inlined_call_operand.hbm [shape: f32[4,2,256], index: 3, kind: output, shape index: {}]  }
   0x1   :  { %9 = vsyncpa [#allocation3], 0 }
   0x2   :  { %11 = vsyncpa [#allocation3 + $0x1], 0  ;;  %s1366_s12 = smov 0   ;;  %s1368_s13 = smov 0  }
   0x3   :  { %s1370_s14 = smov 0   ;;  %s1372_s15 = smov 0  }
   0x4   :  { %s1374_s16 = smov 0   ;;  %s1376_s17 = smov 0  }
   0x5 LB: > { %s1090_s18 = sadd.s32 4294967295, %s1338_s17   ;;  %s1091_s19 = sadd.s32 4294967294, %s1338_s17   ;;  %s1338_s17 = sphi %s1376_s17, %s17_s17   ;;  %s1334_s16 = sphi %s1374_s16, %s1700_s16   ;;  %s1330_s15 = sphi %s1372_s15, %s1699_s15   ;;  %s1326_s14 = sphi %s1370_s14, %s1698_s14   ;;  %s1322_s13 = sphi %s1368_s13, %s1697_s13   ;;  %s1318_s12 = sphi %s1366_s12, %s1696_s12  }
   0x6   : > { %s29_s20 = sadd.s32 1, %s1334_s16  ;;  %s106_s21 = sadd.s32 1, %s1326_s14 }
   0x7   : > { %p31_p0 = scmp.ge.s32.totalorder %s29_s20, 2  ;;  %p116_p1 = scmp.ne.s32.totalorder %s1326_s14, %s1322_s13 }
   0x8   : > { %p117_p2 = scmp.eq.s32.totalorder %s1090_s18, 1  ;;  %p122_p3 = scmp.ne.s32.totalorder %s1322_s13, %s1318_s12 }
   0x9   : > { %s1702_s20 = smov (%p31_p0, %s29_s20), 0  ;;  %p123_p5 = scmp.eq.s32.totalorder %s1091_s19, 1 }
   0xa   : > { %p1406_p4 = por %p117_p2, %p116_p1  ;;  %s101_s23 = ssub.s32 %s1334_s16, %s1702_s20 }
   0xb   : > { %p1092_p6 = scmp.ge.s32.totalorder %s1338_s17, 1  ;;  %p104_p7 = scmp.eq.s32.totalorder %s101_s23, 0 }
   0xc   : > { %p1413_p8 = por %p123_p5, %p122_p3  ;;  %p130_p9 = scmp.lt.s32.totalorder %s1338_s17, 3 }
   0xd   : > { %s1419_s25 = scalar_select %p104_p7, %s1326_s14, %s106_s21  }
   0xe   : > { %p1421_p10 = pnand %p1092_p6, %p130_p9  ;;  %p1425_p11 = scmp.eq.s32.totalorder %s1090_s18, 0 }
   0xf   : > { %s143_s30 = sshll.u32 %s1688_s0, 4  ;;  %s144_s30 = int_to_ptr.vmem [resolvable:$true] %s143_s30 }
  0x10   : > { %p1179_p12 = pneg %p1421_p10  ;;  %s1243_s4 = scalar_lea.vmem %s144_s30, 16 }
  0x11   : > { %p1244_p0 = scmp.ne.s32.totalorder %s144_s30, %s1243_s4  ;;  %p1251_p5 = scmp.lt.s32.totalorder %s144_s30, %s144_s30 }
  0x12   : > { %p1180_p13 = pnand %p1425_p11, %p1179_p12  ;;  %p1252_p6 = scmp.lt.s32.totalorder %s1243_s4, %s1243_s4 }
  0x14   : > { %p1245_p1 = pneg %p1180_p13  ;;  %p1253_p7 = por %p1252_p6, %p1251_p5 }
  0x16   : > { %p1246_p2 = pnand %p1245_p1, %p1244_p0 }
  0x18   : > { %p1247_p3 = pneg %p1246_p2 }
  0x1a   : > { %p1254_p9 = pnand %p1253_p7, %p1247_p3 }
  0x1c   : > { %1257 = shalt.err (!%p1254_p9)
}
  0x1d   : > { %s1340_s5 = smov [#allocation2]   ;;  %168 = sbr.rel (%p1421_p10) target bundleno = 340 (0x154), region = 32 }
  0x1e   : > { %1182 = dma.vmem_to_smem (!%p1180_p13), %s144_s30, 16, %s1340_s5, [#allocation4]  }
  0x22   : > { %1309 = dma.done.wait (%p1425_p11), [#allocation4], 16  }
  0x23   : > { %1311 = vsyncadd (%p1425_p11), [#allocation4], 4294967280 }
  0x24   : > { %174 = sfence }
  0x25   : > { %s1443_s6 = smul.u32 12, %s1330_s15  ;;  %s1123_s7 = sshll.u32 %s1330_s15, 1  ;;  %v1341_v0 = vmov 0.0   ;;  %v1456_v1 = vld [vmem:[%s1689_s1] ss:$2 sm:$0x3]  ;;  %v204_v17 = vlaneseq }
  0x26   : > { %s607_s8 = sadd.s32 1, %s1123_s7  ;;  %510 = vmatprep.mubr.f32.mxu0 %v1341_v0  ;;  %894 = vmatprep.mubr.f32.mxu1 %v1341_v0  ;;  %v1463_v2 = vld [vmem:[%s1689_s1 + $0x1] ss:$2 sm:$0x3]  ;;  %s1156_s23 = sshll.u32 %s1330_s15, 7 }
  0x27   : > { %s212_s9 = sld [smem:[#allocation2 + %s1443_s6]]  ;;  %s213_s10 = sadd.s32 1, %s1443_s6  ;;  %v1470_v22 = vshrl.u32 %v204_v17, 7 }
  0x28   : > { %s214_s11 = sld [smem:[#allocation2 + %s213_s10]]  ;;  %s215_s18 = sadd.s32 2, %s1443_s6 }
  0x29   : > { %s216_s19 = sld [smem:[#allocation2 + %s215_s18]]  ;;  %s1451_s21 = smul.u32 6, %s607_s8  ;;  %v1475_v33 = vsub.s32 1, %v1470_v22  ;;  %v1478_v38 = vsub.s32 0, %v1470_v22  ;;  %v1481_v39 = vadd.s32 8, %v1470_v22 }
  0x2b   : > { %s609_s27 = sld [smem:[#allocation2 + %s1451_s21]]  ;;  %s610_s28 = sadd.s32 1, %s1451_s21 }
  0x2c   : > { %s611_s4 = sld [smem:[#allocation2 + %s610_s28]]  ;;  %s612_s5 = sadd.s32 2, %s1451_s21 }
  0x2d   : > { %v223_v3 = vstv %s212_s9  ;;  %s613_s7 = sld [smem:[#allocation2 + %s612_s5]]  ;;  %s219_s28 = sadd.s32 4, %s1443_s6 }
  0x2e   : > { %v224_v4 = vmul.f32 %v223_v3, %v1456_v1  ;;  %v225_v5 = vstv %s214_s11  ;;  %s220_s30 = sld [smem:[#allocation2 + %s219_s28]]  ;;  %s616_s8 = sadd.s32 4, %s1451_s21 }
  0x2f   : > { %v226_v6 = vmul.f32 %v1463_v2, %v225_v5  ;;  %v228_v7 = vstv %s216_s19  ;;  %s617_s10 = sld [smem:[#allocation2 + %s616_s8]]  ;;  %s618_s11 = sadd.s32 5, %s1451_s21 }
  0x30   : > { %s619_s18 = sld [smem:[#allocation2 + %s618_s11]] }
  0x31   : > { %v227_v8 = vadd.f32 %v226_v6, %v224_v4  ;;  %v620_v9 = vstv %s609_s27  ;;  %s217_s27 = sadd.s32 3, %s1443_s6 }
  0x32   : > { %v621_v10 = vmul.f32 %v620_v9, %v1456_v1  ;;  %v622_v11 = vstv %s611_s4  ;;  %s218_s29 = sld [smem:[#allocation2 + %s217_s27]]  ;;  %s221_s4 = sadd.s32 5, %s1443_s6 }
  0x33   : > { %v229_v12 = vadd.f32 %v228_v7, %v227_v8  ;;  %v623_v13 = vmul.f32 %v1463_v2, %v622_v11  ;;  %v625_v14 = vstv %s613_s7  ;;  %s222_s5 = sld [smem:[#allocation2 + %s221_s4]]  ;;  %s614_s7 = sadd.s32 3, %s1451_s21 }
  0x34   : > { %s615_s9 = sld [smem:[#allocation2 + %s614_s7]]  ;;  %s190_s6 = sand.u32 1, %s1322_s13  }
  0x35   : > { %v230_v15 = vadd.f32 1.0, %v229_v12  ;;  %v624_v16 = vadd.f32 %v623_v13, %v621_v10  ;;  %s1097_s21 = sshll.u32 %s190_s6, 3  ;;  %s1643_s15 = scalar_lea.sflag [#allocation3], %s190_s6 }
  0x36   : > { %s192_s19 = scalar_lea.vmem [#allocation5], %s1097_s21  ;;  %s1343_s4 = smov [#allocation5]  }
  0x37   : > { %v231_v18 = vmul.f32 7.5, %v230_v15  ;;  %v626_v19 = vadd.f32 %v625_v14, %v624_v16  ;;  %s1002_s26 = sshll.u32 %s192_s19, 4  ;;  %s1637_s26 = int_to_ptr.vmem [resolvable:$true] %s1002_s26 }
  0x39   : > { %v241_v20 = vfloor.f32 %v231_v18  ;;  %v627_v21 = vadd.f32 1.0, %v626_v19 }
  0x3b   : > { %v242_v23 = vsub.f32 %v231_v18, %v241_v20  ;;  %v244_v24 = vadd.f32 1.0, %v241_v20  ;;  %vm245_vm0 = vcmp.ge.f32.partialorder %v241_v20, 0.0  ;;  %vm246_vm1 = vcmp.le.f32.partialorder %v241_v20, 15.0 }
  0x3c   : > { %vm247_vm2 = vmand %vm245_vm0, %vm246_vm1  ;;  %v255_v25 = vmax.f32 %v241_v20, -1.0  ;;  %v628_v26 = vmul.f32 7.5, %v627_v21 }
  0x3d   : > { %v243_v27 = vsub.f32 1.0, %v242_v23  ;;  %v1099_v28 = vsel %vm247_vm2, 1.0, %v1341_v0  ;;  %vm250_vm3 = vcmp.ge.f32.partialorder %v244_v24, 0.0  ;;  %vm251_vm4 = vcmp.le.f32.partialorder %v244_v24, 15.0 }
  0x3e   : > { %vm252_vm5 = vmand %vm250_vm3, %vm251_vm4  ;;  %v256_v29 = vmin.f32 %v255_v25, 16.0  ;;  %v258_v30 = vmax.f32 %v244_v24, -1.0  ;;  %v638_v31 = vfloor.f32 %v628_v26  ;;  %vm433_vm4 = vcmask 130048  }
  0x3f   : > { %v1100_v32 = vsel %vm252_vm5, 1.0, %v1341_v0  ;;  %v281_v34 = vmul.f32 %v1099_v28, %v243_v27 }
  0x40   : > { %v1157_v35 = vtrunc.f32 %v256_v29  ;;  %v259_v36 = vmin.f32 %v258_v30, 16.0  ;;  %v317_v37 = vmul.f32 %v1100_v32, %v242_v23  ;;  %v639_v40 = vsub.f32 %v628_v26, %v638_v31 }
  0x41   : > { %v641_v41 = vadd.f32 1.0, %v638_v31  ;;  %vm642_vm6 = vcmp.ge.f32.partialorder %v638_v31, 0.0  ;;  %v290_v44 = vrot.slane %v281_v34, %v1475_v33  ;;  %v286_v45 = vrot.slane %v281_v34, %v1478_v38 }
  0x42   : > { %v1158_v42 = vcvt.f32.s32 %v1157_v35  ;;  %v1159_v43 = vtrunc.f32 %v259_v36  ;;  %v326_v46 = vrot.slane %v317_v37, %v1475_v33  ;;  %vm643_vm7 = vcmp.le.f32.partialorder %v638_v31, 15.0  ;;  %v207_v35 = vld [vmem:[%s1690_s2] sm:$0xff] }
  0x43   : > { %vm647_vm8 = vcmp.ge.f32.partialorder %v641_v41, 0.0  ;;  %vm648_vm9 = vcmp.le.f32.partialorder %v641_v41, 15.0  ;;  %v322_v50 = vrot.slane %v317_v37, %v1478_v38  ;;  %vm644_vm10 = vmand %vm642_vm6, %vm643_vm7  ;;  %v640_v51 = vsub.f32 1.0, %v639_v40 }
  0x44   : > { %v1160_v47 = vcvt.f32.s32 %v1159_v43  ;;  %v268_v48 = vrot.slane %v1158_v42, %v1475_v33  ;;  %v264_v49 = vrot.slane %v1158_v42, %v1478_v38  ;;  %v1124_v52 = vsel %vm644_vm10, 1.0, %v1341_v0  ;;  %vm649_vm11 = vmand %vm647_vm8, %vm648_vm9 }
  0x45   : > { %v652_v53 = vmax.f32 %v638_v31, -1.0  ;;  %v655_v54 = vmax.f32 %v641_v41, -1.0  ;;  %v1125_v59 = vsel %vm649_vm11, 1.0, %v1341_v0  ;;  %v678_v11 = vmul.f32 %v1124_v52, %v640_v51 }
  0x46   : > { %vm272_vm12 = vcmp.eq.s32.totalorder %v1481_v39, %v268_v48  ;;  %v304_v55 = vrot.slane %v1160_v47, %v1475_v33  ;;  %vm271_vm13 = vcmp.eq.s32.totalorder %v1481_v39, %v264_v49  ;;  %v300_v56 = vrot.slane %v1160_v47, %v1478_v38 }
  0x47   : > { %v1104_v57 = vsel %vm272_vm12, 1.0, %v1341_v0  ;;  %v1103_v58 = vsel %vm271_vm13, 1.0, %v1341_v0  ;;  %vm270_vm14 = vcmp.eq.s32.totalorder %v1470_v22, %v268_v48  ;;  %v653_v9 = vmin.f32 %v652_v53, 16.0 }
  0x48   : > { %v296_v60 = vmul.f32 %v1104_v57, %v290_v44  ;;  %vm308_vm15 = vcmp.eq.s32.totalorder %v1481_v39, %v304_v55  ;;  %v295_v61 = vmul.f32 %v1103_v58, %v286_v45  ;;  %vm307_vm0 = vcmp.eq.s32.totalorder %v1481_v39, %v300_v56  ;;  %v209_v58 = vld [vmem:[%s1690_s2 + $0x10] sm:$0xff] }
  0x49   : > { %v1108_v62 = vsel %vm308_vm15, 1.0, %v1341_v0  ;;  %v1107_v63 = vsel %vm307_vm0, 1.0, %v1341_v0  ;;  %v1102_v3 = vsel %vm270_vm14, 1.0, %v1341_v0  ;;  %vm306_vm1 = vcmp.eq.s32.totalorder %v1470_v22, %v304_v55 }
  0x4a   : > { %v332_v4 = vmul.f32 %v1108_v62, %v326_v46  ;;  %v331_v5 = vmul.f32 %v1107_v63, %v322_v50  ;;  %v294_v6 = vmul.f32 %v1102_v3, %v290_v44  ;;  %v1106_v7 = vsel %vm306_vm1, 1.0, %v1341_v0 }
  0x4b   : > { %v330_v8 = vmul.f32 %v1106_v7, %v326_v46  ;;  %v656_v10 = vmin.f32 %v655_v54, 16.0  ;;  %v714_v14 = vmul.f32 %v1125_v59, %v639_v40  ;;  %vm269_vm2 = vcmp.eq.s32.totalorder %v1470_v22, %v264_v49  ;;  %v208_v46 = vld [vmem:[%s1690_s2 + $0x8] sm:$0xff] }
  0x4c   : > { %v336_v12 = vadd.f32 %v332_v4, %v296_v60  ;;  %v335_v13 = vadd.f32 %v331_v5, %v295_v61  ;;  %v1165_v16 = vtrunc.f32 %v653_v9  ;;  %v687_v18 = vrot.slane %v678_v11, %v1475_v33  ;;  %v210_v60 = vld [vmem:[%s1690_s2 + $0x18] sm:$0xff] }
  0x4d   : > { %v334_v15 = vadd.f32 %v330_v8, %v294_v6  ;;  %v1167_v17 = vtrunc.f32 %v656_v10  ;;  %v1101_v19 = vsel %vm269_vm2, 1.0, %v1341_v0  ;;  %vm305_vm3 = vcmp.eq.s32.totalorder %v1470_v22, %v300_v56 }
  0x4e   : > { %474 = vmatprep.subr.mxu0 %v336_v12  ;;  %v1166_v20 = vcvt.f32.s32 %v1165_v16  ;;  %v293_v23 = vmul.f32 %v1101_v19, %v286_v45  ;;  %v1105_v24 = vsel %vm305_vm3, 1.0, %v1341_v0  ;;  %v723_v25 = vrot.slane %v714_v14, %v1475_v33 }
  0x4f   : > { %475 = vmatpush1.msra.mxu0 %v335_v13  ;;  %v1168_v21 = vcvt.f32.s32 %v1167_v17  ;;  %v329_v26 = vmul.f32 %v1105_v24, %v322_v50  ;;  %v683_v27 = vrot.slane %v678_v11, %v1478_v38  ;;  %v719_v28 = vrot.slane %v714_v14, %v1478_v38 }
  0x50   : > { %476 = vmatprep.subr.mxu0 %v334_v15  ;;  %v665_v29 = vrot.slane %v1166_v20, %v1475_v33  ;;  %v661_v31 = vrot.slane %v1166_v20, %v1478_v38  ;;  %v232_v61 = vstv %s218_s29  ;;  %v234_v62 = vstv %s220_s30  ;;  %s1635_s29 = scalar_lea.hbm %s1691_s3, %s1156_s23  ;;  %s1258_s30 = scalar_lea.vmem %s1637_s26, 128 }
  0x51   : > { %v701_v30 = vrot.slane %v1168_v21, %v1475_v33  ;;  %v697_v32 = vrot.slane %v1168_v21, %v1478_v38  ;;  %v333_v34 = vadd.f32 %v329_v26, %v293_v23  ;;  %v233_v63 = vmul.f32 %v232_v61, %v1456_v1  ;;  %p1259_p10 = scmp.ne.s32.totalorder %s1637_s26, %s1258_s30 }
  0x52   : > { %vm669_vm5 = vcmp.eq.s32.totalorder %v1481_v39, %v665_v29  ;;  %vm668_vm7 = vcmp.eq.s32.totalorder %v1481_v39, %v661_v31  ;;  %vm667_vm9 = vcmp.eq.s32.totalorder %v1470_v22, %v665_v29  ;;  %vm666_vm11 = vcmp.eq.s32.totalorder %v1470_v22, %v661_v31 }
  0x53   : > { %vm705_vm6 = vcmp.eq.s32.totalorder %v1481_v39, %v701_v30  ;;  %vm704_vm8 = vcmp.eq.s32.totalorder %v1481_v39, %v697_v32  ;;  %v1129_v36 = vsel %vm669_vm5, 1.0, %v1341_v0  ;;  %477 = vmatpush1.msra.mxu0 %v333_v34  ;;  %v1128_v40 = vsel %vm668_vm7, 1.0, %v1341_v0  ;;  %p1260_p11 = pnand %p1259_p10, %p1406_p4 }
  0x54   : > { %v1133_v37 = vsel %vm705_vm6, 1.0, %v1341_v0  ;;  %v1132_v41 = vsel %vm704_vm8, 1.0, %v1341_v0  ;;  %v693_v42 = vmul.f32 %v1129_v36, %v687_v18  ;;  %v692_v44 = vmul.f32 %v1128_v40, %v683_v27  ;;  %1119 = vmatmul.mubr.msk.f32.vlgmr.msra.gmra.mxu0 %vm433_vm4, %v207_v35 }
  0x55   : > { %v729_v43 = vmul.f32 %v1133_v37, %v723_v25  ;;  %v728_v45 = vmul.f32 %v1132_v41, %v719_v28  ;;  %vm703_vm10 = vcmp.eq.s32.totalorder %v1470_v22, %v701_v30  ;;  %vm702_vm12 = vcmp.eq.s32.totalorder %v1470_v22, %v697_v32  ;;  %516 = vmatprep.mubr.f32.mxu0 %v1341_v0  ;;  %p1261_p12 = pneg %p1260_p11 }
  0x56   : > { %v1127_v49 = vsel %vm667_vm9, 1.0, %v1341_v0  ;;  %v1131_v50 = vsel %vm703_vm10, 1.0, %v1341_v0  ;;  %v1126_v53 = vsel %vm666_vm11, 1.0, %v1341_v0  ;;  %v1130_v54 = vsel %vm702_vm12, 1.0, %v1341_v0 }
  0x57   : > { %v733_v47 = vadd.f32 %v729_v43, %v693_v42  ;;  %v732_v48 = vadd.f32 %v728_v45, %v692_v44  ;;  %v691_v51 = vmul.f32 %v1127_v49, %v687_v18  ;;  %v727_v52 = vmul.f32 %v1131_v50, %v723_v25 }
  0x58   : > { %v690_v55 = vmul.f32 %v1126_v53, %v683_v27  ;;  %v726_v56 = vmul.f32 %v1130_v54, %v719_v28  ;;  %1120 = vmatmul.mubr.msk.f32.gmra.mxu0 %vm433_vm4, %v208_v46  ;;  %v235_v3 = vmul.f32 %v1463_v2, %v234_v62  ;;  %v237_v5 = vstv %s222_s5  ;;  %s1262_s5 = sshll.u32 %s1343_s4, 4  ;;  %s1263_s5 = int_to_ptr.vmem [resolvable:$false] %s1262_s5 }
  0x59   : > { %858 = vmatprep.subr.mxu1 %v733_v47  ;;  %v731_v57 = vadd.f32 %v727_v52, %v691_v51  ;;  %522 = vmatprep.mubr.f32.mxu0 %v1341_v0  ;;  %v629_v7 = vstv %s615_s9  ;;  %v631_v8 = vstv %s617_s10  ;;  %v634_v14 = vstv %s619_s18  ;;  %s1264_s7 = scalar_lea.vmem %s1263_s5, 256  ;;  %p1265_p13 = scmp.lt.s32.totalorder %s1637_s26, %s1263_s5 }
  0x5a   : > { %859 = vmatpush1.msra.mxu1 %v732_v48  ;;  %v730_v59 = vadd.f32 %v726_v56, %v690_v55  ;;  %v236_v4 = vadd.f32 %v235_v3, %v233_v63  ;;  %v630_v10 = vmul.f32 %v629_v7, %v1456_v1  ;;  %v632_v11 = vmul.f32 %v1463_v2, %v631_v8  ;;  %p1266_p0 = scmp.lt.s32.totalorder %s1264_s7, %s1258_s30 }
  0x5b   : > { %860 = vmatprep.subr.mxu1 %v731_v57 }
  0x5c   : > { %861 = vmatpush1.msra.mxu1 %v730_v59  ;;  %1121 = vmatmul.mubr.msk.f32.gmra.mxu0 %vm433_vm4, %v209_v58  ;;  %v238_v6 = vadd.f32 %v237_v5, %v236_v4  ;;  %v633_v13 = vadd.f32 %v632_v11, %v630_v10  ;;  %p1267_p1 = por %p1266_p0, %p1265_p13 }
  0x5d   : > { %1144 = vmatmul.mubr.msk.f32.vlgmr.msra.gmra.mxu1 %vm433_vm4, %v207_v35  ;;  %528 = vmatprep.mubr.f32.mxu0 %v1341_v0 }
  0x5e   : > { %900 = vmatprep.mubr.f32.mxu1 %v1341_v0  ;;  %v239_v9 = vadd.f32 1.0, %v238_v6  ;;  %v635_v16 = vadd.f32 %v634_v14, %v633_v13  ;;  %p1268_p2 = pnand %p1267_p1, %p1261_p12 }
  0x60   : > { %1122 = vmatmul.mubr.msk.f32.gmra.mxu0 %vm433_vm4, %v210_v60  ;;  %v240_v12 = vmul.f32 7.5, %v239_v9  ;;  %v636_v18 = vadd.f32 1.0, %v635_v16 }
  0x61   : > { %1145 = vmatmul.mubr.msk.f32.gmra.mxu1 %vm433_vm4, %v208_v46 }
  0x62   : > { %906 = vmatprep.mubr.f32.mxu1 %v1341_v0  ;;  %v337_v15 = vfloor.f32 %v240_v12  ;;  %v637_v21 = vmul.f32 7.5, %v636_v18 }
  0x64   : > { %v340_v17 = vadd.f32 1.0, %v337_v15  ;;  %v351_v19 = vmax.f32 %v337_v15, -1.0  ;;  %v734_v25 = vfloor.f32 %v637_v21  ;;  %vm341_vm13 = vcmp.ge.f32.partialorder %v337_v15, 0.0 }
  0x65   : > { %1146 = vmatmul.mubr.msk.f32.gmra.mxu1 %vm433_vm4, %v209_v58  ;;  %vm342_vm14 = vcmp.le.f32.partialorder %v337_v15, 15.0  ;;  %v338_v28 = vsub.f32 %v240_v12, %v337_v15 }
  0x66   : > { %912 = vmatprep.mubr.f32.mxu1 %v1341_v0  ;;  %v354_v20 = vmax.f32 %v340_v17, -1.0  ;;  %v352_v23 = vmin.f32 %v351_v19, 16.0  ;;  %vm346_vm15 = vcmp.ge.f32.partialorder %v340_v17, 0.0  ;;  %vm347_vm0 = vcmp.le.f32.partialorder %v340_v17, 15.0  ;;  %vm343_vm1 = vmand %vm341_vm13, %vm342_vm14 }
  0x67   : > { %v737_v1 = vadd.f32 1.0, %v734_v25  ;;  %v748_v2 = vmax.f32 %v734_v25, -1.0  ;;  %vm348_vm2 = vmand %vm346_vm15, %vm347_vm0  ;;  %v339_v34 = vsub.f32 1.0, %v338_v28  ;;  %v1109_v35 = vsel %vm343_vm1, 1.0, %v1341_v0 }
  0x68   : > { %v355_v24 = vmin.f32 %v354_v20, 16.0  ;;  %v1161_v26 = vtrunc.f32 %v352_v23  ;;  %v1110_v36 = vsel %vm348_vm2, 1.0, %v1341_v0  ;;  %vm738_vm3 = vcmp.ge.f32.partialorder %v734_v25, 0.0 }
  0x69   : > { %1147 = vmatmul.mubr.msk.f32.gmra.mxu1 %vm433_vm4, %v210_v60  ;;  %v749_v31 = vmin.f32 %v748_v2, 16.0  ;;  %v751_v32 = vmax.f32 %v737_v1, -1.0  ;;  %v377_v43 = vmul.f32 %v1109_v35, %v339_v34  ;;  %v413_v44 = vmul.f32 %v1110_v36, %v338_v28 }
  0x6a   : > { %v1163_v27 = vtrunc.f32 %v355_v24  ;;  %v1162_v29 = vcvt.f32.s32 %v1161_v26  ;;  %vm739_vm4 = vcmp.le.f32.partialorder %v734_v25, 15.0  ;;  %v735_v45 = vsub.f32 %v637_v21, %v734_v25 }
  0x6b   : > { %v1169_v41 = vtrunc.f32 %v749_v31  ;;  %v752_v42 = vmin.f32 %v751_v32, 16.0  ;;  %vm740_vm7 = vmand %vm738_vm3, %vm739_vm4  ;;  %v382_v50 = vrot.slane %v377_v43, %v1478_v38  ;;  %v418_v51 = vrot.slane %v413_v44, %v1478_v38 }
  0x6c   : > { %v1164_v30 = vcvt.f32.s32 %v1163_v27  ;;  %v360_v37 = vrot.slane %v1162_v29, %v1478_v38  ;;  %v364_v46 = vrot.slane %v1162_v29, %v1475_v33  ;;  %vm743_vm8 = vcmp.ge.f32.partialorder %v737_v1, 0.0 }
  0x6d   : > { %v1170_v48 = vcvt.f32.s32 %v1169_v41  ;;  %v1171_v49 = vtrunc.f32 %v752_v42  ;;  %vm744_vm9 = vcmp.le.f32.partialorder %v737_v1, 15.0  ;;  %v736_v54 = vsub.f32 1.0, %v735_v45 }
  0x6e   : > { %v396_v40 = vrot.slane %v1164_v30, %v1478_v38  ;;  %vm365_vm5 = vcmp.eq.s32.totalorder %v1470_v22, %v360_v37  ;;  %v400_v47 = vrot.slane %v1164_v30, %v1475_v33  ;;  %v1134_v55 = vsel %vm740_vm7, 1.0, %v1341_v0  ;;  %vm745_vm14 = vmand %vm743_vm8, %vm744_vm9 }
  0x6f   : > { %v1111_v52 = vsel %vm365_vm5, 1.0, %v1341_v0  ;;  %vm367_vm10 = vcmp.eq.s32.totalorder %v1481_v39, %v360_v37  ;;  %vm366_vm12 = vcmp.eq.s32.totalorder %v1470_v22, %v364_v46  ;;  %v1172_v56 = vcvt.f32.s32 %v1171_v49 }
  0x70   : > { %vm401_vm6 = vcmp.eq.s32.totalorder %v1470_v22, %v396_v40  ;;  %vm403_vm11 = vcmp.eq.s32.totalorder %v1481_v39, %v396_v40  ;;  %vm402_vm13 = vcmp.eq.s32.totalorder %v1470_v22, %v400_v47  ;;  %v757_v57 = vrot.slane %v1170_v48, %v1478_v38 }
  0x71   : > { %v1115_v53 = vsel %vm401_vm6, 1.0, %v1341_v0  ;;  %v389_v58 = vmul.f32 %v1111_v52, %v382_v50  ;;  %vm368_vm15 = vcmp.eq.s32.totalorder %v1481_v39, %v364_v46  ;;  %vm404_vm0 = vcmp.eq.s32.totalorder %v1481_v39, %v400_v47 }
  0x72   : > { %v425_v59 = vmul.f32 %v1115_v53, %v418_v51  ;;  %v386_v60 = vrot.slane %v377_v43, %v1475_v33  ;;  %v422_v61 = vrot.slane %v413_v44, %v1475_v33  ;;  %v1113_v62 = vsel %vm367_vm10, 1.0, %v1341_v0 }
  0x73   : > { %v1117_v63 = vsel %vm403_vm11, 1.0, %v1341_v0  ;;  %v1112_v3 = vsel %vm366_vm12, 1.0, %v1341_v0  ;;  %v1116_v4 = vsel %vm402_vm13, 1.0, %v1341_v0  ;;  %v1135_v5 = vsel %vm745_vm14, 1.0, %v1341_v0 }
  0x74   : > { %v774_v6 = vmul.f32 %v1134_v55, %v736_v54  ;;  %vm762_vm1 = vcmp.eq.s32.totalorder %v1470_v22, %v757_v57  ;;  %v793_v7 = vrot.slane %v1172_v56, %v1478_v38  ;;  %v1114_v8 = vsel %vm368_vm15, 1.0, %v1341_v0 }
  0x75   : > { %v1118_v9 = vsel %vm404_vm0, 1.0, %v1341_v0  ;;  %v391_v10 = vmul.f32 %v1113_v62, %v382_v50  ;;  %v427_v11 = vmul.f32 %v1117_v63, %v418_v51  ;;  %v761_v12 = vrot.slane %v1170_v48, %v1475_v33 }
  0x76   : > { %v797_v13 = vrot.slane %v1172_v56, %v1475_v33  ;;  %v390_v14 = vmul.f32 %v1112_v3, %v386_v60  ;;  %v426_v15 = vmul.f32 %v1116_v4, %v422_v61  ;;  %v810_v16 = vmul.f32 %v1135_v5, %v735_v45 }
  0x77   : > { %v429_v17 = vadd.f32 %v425_v59, %v389_v58  ;;  %v392_v18 = vmul.f32 %v1114_v8, %v386_v60  ;;  %v428_v19 = vmul.f32 %v1118_v9, %v422_v61  ;;  %v1136_v21 = vsel %vm762_vm1, 1.0, %v1341_v0 }
  0x78   : > { %vm798_vm2 = vcmp.eq.s32.totalorder %v1470_v22, %v793_v7  ;;  %vm764_vm3 = vcmp.eq.s32.totalorder %v1481_v39, %v757_v57  ;;  %vm800_vm4 = vcmp.eq.s32.totalorder %v1481_v39, %v793_v7  ;;  %v779_v23 = vrot.slane %v774_v6, %v1478_v38 }
  0x79   : > { %v431_v24 = vadd.f32 %v427_v11, %v391_v10  ;;  %vm763_vm5 = vcmp.eq.s32.totalorder %v1470_v22, %v761_v12  ;;  %vm799_vm6 = vcmp.eq.s32.totalorder %v1470_v22, %v797_v13  ;;  %v430_v25 = vadd.f32 %v426_v15, %v390_v14 }
  0x7a   : > { %v815_v27 = vrot.slane %v810_v16, %v1478_v38  ;;  %vm765_vm7 = vcmp.eq.s32.totalorder %v1481_v39, %v761_v12  ;;  %vm801_vm8 = vcmp.eq.s32.totalorder %v1481_v39, %v797_v13  ;;  %v1140_v1 = vsel %vm798_vm2, 1.0, %v1341_v0 }
  0x7b   : > { %v432_v2 = vadd.f32 %v428_v19, %v392_v18  ;;  %v1138_v28 = vsel %vm764_vm3, 1.0, %v1341_v0  ;;  %v1142_v29 = vsel %vm800_vm4, 1.0, %v1341_v0  ;;  %v1137_v31 = vsel %vm763_vm5, 1.0, %v1341_v0 }
  0x7c   : > { %v783_v32 = vrot.slane %v774_v6, %v1475_v33  ;;  %v1141_v34 = vsel %vm799_vm6, 1.0, %v1341_v0  ;;  %v819_v38 = vrot.slane %v810_v16, %v1475_v33  ;;  %v1139_v39 = vsel %vm765_vm7, 1.0, %v1341_v0 }
  0x7d   : > { %v1143_v37 = vsel %vm801_vm8, 1.0, %v1341_v0  ;;  %v786_v40 = vmul.f32 %v1136_v21, %v779_v23  ;;  %v822_v41 = vmul.f32 %v1140_v1, %v815_v27  ;;  %v788_v43 = vmul.f32 %v1138_v28, %v779_v23 }
  0x7e   : > { %v824_v44 = vmul.f32 %v1142_v29, %v815_v27  ;;  %v787_v48 = vmul.f32 %v1137_v31, %v783_v32  ;;  %v823_v49 = vmul.f32 %v1141_v34, %v819_v38  ;;  %v789_v51 = vmul.f32 %v1139_v39, %v783_v32 }
  0x7f   : > { %v825_v52 = vmul.f32 %v1143_v37, %v819_v38  ;;  %v826_v55 = vadd.f32 %v822_v41, %v786_v40  ;;  %vm596_vm9 = vcmask 1041409   ;;  %vm598_vm10 = vcmask 1043459  }
  0x80   : > { %v828_v56 = vadd.f32 %v824_v44, %v788_v43  ;;  %v827_v59 = vadd.f32 %v823_v49, %v787_v48  ;;  %vm600_vm11 = vcmask 1045509   ;;  %vm602_vm12 = vcmask 1047559  }
  0x81   : > { %v829_v60 = vadd.f32 %v825_v52, %v789_v51 }
 0x114   : > { %v512_v20 = vpop.f32.mrf.mxu0 }
 0x115   : > { %v535_v35 = vmul.f32 %v512_v20, %v429_v17 }
 0x116   : > { %v514_v26 = vpop.f32.mrf.mxu0 }
 0x117   : > { %v536_v45 = vmul.f32 %v514_v26, %v430_v25 }
 0x118   : > { %v518_v30 = vpop.f32.mrf.mxu0 }
 0x119   : > { %v537_v36 = vmul.f32 %v518_v30, %v431_v24 }
 0x11a   : > { %v520_v42 = vpop.f32.mrf.mxu0 }
 0x11b   : > { %v543_v46 = vadd.f32 %v537_v36, %v535_v35  ;;  %v538_v47 = vmul.f32 %v520_v42, %v432_v2  ;;  %v1342_v36 = vmov 1983009808  }
 0x11c   : > { %v524_v50 = vpop.f32.mrf.mxu0  ;;  %v577_v39 = vunpack.c.l.s4 %v1342_v36 }
 0x11d   : > { %v896_v33 = vpop.f32.mrf.mxu1  ;;  %v544_v53 = vrot.slane %v543_v46, 4  ;;  %v550_v54 = vadd.f32 %v538_v47, %v536_v45  ;;  %v539_v4 = vmul.f32 %v524_v50, %v429_v17 }
 0x11e   : > { %v526_v57 = vpop.f32.mrf.mxu0  ;;  %v919_v6 = vmul.f32 %v896_v33, %v826_v55  ;;  %v578_v33 = vunpack.c.0.s8 %v577_v39 }
 0x11f   : > { %v898_v0 = vpop.f32.mrf.mxu1  ;;  %v551_v58 = vrot.slane %v550_v54, 4  ;;  %v545_v62 = vadd.f32 %v544_v53, %v543_v46  ;;  %v540_v11 = vmul.f32 %v526_v57, %v430_v25 }
 0x120   : > { %v530_v61 = vpop.f32.mrf.mxu0  ;;  %v920_v14 = vmul.f32 %v898_v0, %v827_v59 }
 0x121   : > { %v552_v63 = vadd.f32 %v551_v58, %v550_v54  ;;  %v902_v3 = vpop.f32.mrf.mxu1  ;;  %v541_v5 = vmul.f32 %v530_v61, %v431_v24  ;;  %v546_v18 = vrot.slane %v545_v62, 2 }
 0x122   : > { %v921_v7 = vmul.f32 %v902_v3, %v828_v56  ;;  %v532_v8 = vpop.f32.mrf.mxu0 }
 0x123   : > { %v553_v9 = vrot.slane %v552_v63, 2  ;;  %v904_v10 = vpop.f32.mrf.mxu1  ;;  %v557_v12 = vadd.f32 %v541_v5, %v539_v4  ;;  %v542_v13 = vmul.f32 %v532_v8, %v432_v2  ;;  %v547_v29 = vadd.f32 %v546_v18, %v545_v62 }
 0x124   : > { %v927_v15 = vadd.f32 %v921_v7, %v919_v6  ;;  %v922_v16 = vmul.f32 %v904_v10, %v829_v60 }
 0x125   : > { %v908_v19 = vpop.f32.mrf.mxu1  ;;  %v558_v20 = vrot.slane %v557_v12, 4  ;;  %v564_v21 = vadd.f32 %v542_v13, %v540_v11  ;;  %v554_v27 = vadd.f32 %v553_v9, %v552_v63  ;;  %v548_v46 = vrot.slane %v547_v29, 1 }
 0x126   : > { %v928_v23 = vrot.slane %v927_v15, 4  ;;  %v934_v26 = vadd.f32 %v922_v16, %v920_v14  ;;  %v923_v34 = vmul.f32 %v908_v19, %v826_v55  ;;  %v581_v63 = vsub.s32 %v578_v33, %v1470_v22 }
 0x127   : > { %v559_v17 = vadd.f32 %v558_v20, %v557_v12  ;;  %v910_v24 = vpop.f32.mrf.mxu1  ;;  %v565_v1 = vrot.slane %v564_v21, 4  ;;  %v555_v35 = vrot.slane %v554_v27, 1  ;;  %v549_v57 = vadd.f32 %v548_v46, %v547_v29 }
 0x128   : > { %v935_v28 = vrot.slane %v934_v26, 4  ;;  %v929_v32 = vadd.f32 %v928_v23, %v927_v15  ;;  %v924_v43 = vmul.f32 %v910_v24, %v827_v59 }
 0x129   : > { %v560_v30 = vrot.slane %v559_v17, 2  ;;  %v566_v31 = vadd.f32 %v565_v1, %v564_v21  ;;  %v914_v25 = vpop.f32.mrf.mxu1  ;;  %v556_v52 = vadd.f32 %v555_v35, %v554_v27 }
 0x12a   : > { %v936_v2 = vadd.f32 %v935_v28, %v934_v26  ;;  %v925_v38 = vmul.f32 %v914_v25, %v828_v56  ;;  %v930_v49 = vrot.slane %v929_v32, 2 }
 0x12b   : > { %v561_v37 = vadd.f32 %v560_v30, %v559_v17  ;;  %v567_v40 = vrot.slane %v566_v31, 2  ;;  %v916_v41 = vpop.f32.mrf.mxu1  ;;  %v575_v62 = vcombine.low %v549_v57, %v556_v52 }
 0x12c   : > { %v937_v42 = vrot.slane %v936_v2, 2  ;;  %v941_v44 = vadd.f32 %v925_v38, %v923_v34  ;;  %v926_v45 = vmul.f32 %v916_v41, %v829_v60  ;;  %v931_v61 = vadd.f32 %v930_v49, %v929_v32 }
 0x12d   : > { %v562_v47 = vrot.slane %v561_v37, 1  ;;  %v568_v48 = vadd.f32 %v567_v40, %v566_v31  ;;  %v582_v11 = vrot.slane %v575_v62, %v581_v63 }
 0x12e   : > { %v942_v50 = vrot.slane %v941_v44, 4  ;;  %v948_v51 = vadd.f32 %v926_v45, %v924_v43  ;;  %v938_v54 = vadd.f32 %v937_v42, %v936_v2  ;;  %v932_v8 = vrot.slane %v931_v61, 1 }
 0x12f   : > { %v569_v53 = vrot.slane %v568_v48, 1  ;;  %v563_v0 = vadd.f32 %v562_v47, %v561_v37 }
 0x130   : > { %v943_v55 = vadd.f32 %v942_v50, %v941_v44  ;;  %v949_v56 = vrot.slane %v948_v51, 4  ;;  %v939_v4 = vrot.slane %v938_v54, 1  ;;  %v933_v15 = vadd.f32 %v932_v8, %v931_v61 }
 0x131   : > { %v570_v58 = vadd.f32 %v569_v53, %v568_v48 }
 0x132   : > { %v944_v59 = vrot.slane %v943_v55, 2  ;;  %v950_v60 = vadd.f32 %v949_v56, %v948_v51  ;;  %v940_v13 = vadd.f32 %v939_v4, %v938_v54 }
 0x133   : > { %v583_v3 = vcombine.low %v563_v0, %v570_v58 }
 0x134   : > { %v945_v5 = vadd.f32 %v944_v59, %v943_v55  ;;  %v951_v6 = vrot.slane %v950_v60, 2  ;;  %v959_v21 = vcombine.low %v933_v15, %v940_v13 }
 0x135   : > { %v590_v7 = vrot.slane %v583_v3, %v581_v63 }
 0x136   : > { %v946_v9 = vrot.slane %v945_v5, 1  ;;  %v952_v10 = vadd.f32 %v951_v6, %v950_v60  ;;  %v966_v17 = vrot.slane %v959_v21, %v581_v63 }
 0x137   : > { %v595_v12 = vrot.slane %v590_v7, 7 }
 0x138   : > { %v953_v14 = vrot.slane %v952_v10, 1  ;;  %v947_v16 = vadd.f32 %v946_v9, %v945_v5 }
 0x139   : > { %v597_v22 = vsel %vm596_vm9, %v595_v12, %v582_v11 }
 0x13a   : > { %v954_v18 = vadd.f32 %v953_v14, %v952_v10  ;;  %v599_v19 = vsel %vm598_vm10, %v595_v12, %v597_v22 }
 0x13b   : > { %v601_v20 = vsel %vm600_vm11, %v595_v12, %v599_v19 }
 0x13c   : > { %v967_v23 = vcombine.low %v947_v16, %v954_v18  ;;  %v603_v26 = vsel %vm602_vm12, %v595_v12, %v601_v20 }
 0x13d   : > { %605 = vst [vmem:[%s192_s19] sm:$0xf] %v603_v26 }
 0x13e   : > { %v974_v27 = vrot.slane %v967_v23, %v581_v63 }
 0x140   : > { %v977_v24 = vrot.slane %v974_v27, 7 }
 0x142   : > { %v978_v1 = vsel %vm596_vm9, %v977_v24, %v966_v17 }
 0x143   : > { %v979_v28 = vsel %vm598_vm10, %v977_v24, %v978_v1 }
 0x144   : > { %v980_v29 = vsel %vm600_vm11, %v977_v24, %v979_v28 }
 0x145   : > { %v981_v30 = vsel %vm602_vm12, %v977_v24, %v980_v29 }
 0x146   : > { %1148 = vst [vmem:[%s192_s19 + $0x4] sm:$0xf] %v981_v30 }
 0x147   : > { %1271 = shalt.err (!%p1268_p2)
}
 0x148   : > { %s1272_s8 = scalar_lea.hbm %s1635_s29, 128  ;;  %s1276_s11 = scalar_lea.hbm %s1691_s3, 256 }
 0x149   : > { %p1273_p3 = scmp.ne.s32.totalorder %s1635_s29, %s1272_s8  ;;  %p1277_p7 = scmp.lt.s32.totalorder %s1635_s29, %s1691_s3 }
 0x14a   : > { %p1278_p9 = scmp.lt.s32.totalorder %s1276_s11, %s1272_s8 }
 0x14b   : > { %p1274_p5 = pnand %p1273_p3, %p1406_p4 }
 0x14c   : > { %p1279_p10 = por %p1278_p9, %p1277_p7 }
 0x14d   : > { %p1275_p6 = pneg %p1274_p5 }
 0x14f   : > { %p1280_p11 = pnand %p1279_p10, %p1275_p6 }
 0x151   : > { %1283 = shalt.err (!%p1280_p11)
}
 0x152   : > { %s1344_s21 = smov 64   ;;  %s1345_s19 = smov 4  }
 0x153   : > { %1177 = dma.vmem_to_hbm [thread:$0]  (%p1406_p4), %s1637_s26, 128, %s1635_s29, %s1643_s15, %s1344_s21, %s1344_s21, %s1345_s19  }
 0x154 PF: > { %p1189_p12 = scmp.ge.s32.totalorder %s1338_s17, 2  ;;  %s1017_s23 = sand.u32 1, %s1318_s12  }
 0x155   : > { %s1018_s27 = scalar_lea.sflag [#allocation3], %s1017_s23 }
 0x156   : > { %p1184_p13 = pnand %p1189_p12, %p1413_p8 }
 0x158   : > { %p1185_p0 = pneg %p1184_p13 }
 0x15a   : > { %1313 = dma.done.wait (%p1185_p0), %s1018_s27, 128  }
 0x15b   : > { %1315 = vsyncadd (%p1185_p0), %s1018_s27, 4294967168  ;;  %s17_s17 = sadd.s32 1, %s1338_s17   ;;  %s1696_s12 = smov %s1322_s13 }
 0x15c   : > { %p14_p1 = scmp.ge.s32.totalorder %s17_s17, 4   ;;  %s1697_s13 = smov %s1326_s14 }
 0x15d   : > { %s1698_s14 = smov %s1419_s25  ;;  %s1699_s15 = smov %s1334_s16 }
 0x15e   : > { %s1700_s16 = smov %s1702_s20  ;;  %16 = sbr.rel (!%p14_p1) target bundleno = 5 (0x5), region = 74 }
 0x163   :  { %1023 = vsyncpa [#allocation3], 1 }
 0x164   :  { %1025 = vsyncpa [#allocation3 + $0x1], 1 }
 0x165   :  { %1026 = vsyncpa [#allocation4], 1 }
 0x166   :  { %1028 = vsyncpa [#allocation4 + $0x1], 1 }

</bundles_post_ra>
